<compile_context>
chip_gen: v5e
topology: v5e:2x2
jax: 0.10.0
libtpu: 0.0.40
codegen_flags: <defaults>
</compile_context>

<pallas_src>
import math

import jax
import jax.numpy as jnp
from jax.experimental import pallas as pl
from jax.experimental.pallas import tpu as pltpu

# ---- tiny synthetic BERT config ----
BATCH = 2
SEQ = 8
HIDDEN = 32
NUM_HEADS = 2
HEAD_DIM = HIDDEN // NUM_HEADS
INTERMEDIATE = 64
NUM_LAYERS = 2
VOCAB = 64
MAX_POS = 16
PAD_ID = 0
LN_EPS = 1e-12
LANE = 128
OUT_ROWS = SEQ * HIDDEN // LANE
assert SEQ * HIDDEN % LANE == 0


# ---------------- in-kernel helpers ----------------
def _layer_norm(x, gamma, beta):
    mean = jnp.mean(x, axis=-1, keepdims=True)
    var = jnp.mean((x - mean) ** 2, axis=-1, keepdims=True)
    return (x - mean) * jax.lax.rsqrt(var + LN_EPS) * gamma + beta


def _gelu(x):
    # tanh approximation of GELU; HF BERT uses erf-GELU, delta < 1e-3.
    c = math.sqrt(2.0 / math.pi)
    return 0.5 * x * (1.0 + jnp.tanh(c * (x + 0.044715 * x * x * x)))


def _to_lane_dense(h):
    # [S, H] f32 -> [S*H/128, 128] by lane-concatenating groups of sublanes
    # (explicit concat instead of a generic reshape relayout).
    per_row = LANE // HIDDEN
    rows = []
    for r in range(OUT_ROWS):
        rows.append(jnp.concatenate(
            [h[r * per_row + i:r * per_row + i + 1, :] for i in range(per_row)], axis=1))
    return jnp.concatenate(rows, axis=0)


# ---------------- fused encoder kernel (one batch element per grid step) ----------------
def bert_encoder_kernel(emb_ref, mask_ref, emb_g_ref, emb_b_ref,
                        wqkv_ref, bqkv_ref, wo_ref, bo_ref,
                        g1_ref, be1_ref, w1_ref, b1_ref, w2_ref, b2_ref,
                        g2_ref, be2_ref, out_ref):
    bf16 = jnp.bfloat16
    scale = 1.0 / math.sqrt(HEAD_DIM)

    bias = mask_ref[0]                                              # [1, S] additive key-mask bias
    h = _layer_norm(emb_ref[0], emb_g_ref[...], emb_b_ref[...])     # embedding LayerNorm (f32)

    for li in range(NUM_LAYERS):                                    # static unroll over stacked weights
        # ---- self-attention: fused QKV projection ----
        qkv = jnp.dot(h.astype(bf16), wqkv_ref[li],
                      preferred_element_type=jnp.float32) + bqkv_ref[li]   # [S, 3H] f32
        q = qkv[:, :HIDDEN]
        k = qkv[:, HIDDEN:2 * HIDDEN]
        v = qkv[:, 2 * HIDDEN:]

        # head-batched layout [NH, S, D] built by lane slicing + stack (no 3-D transpose)
        qh = jnp.stack([q[:, hd * HEAD_DIM:(hd + 1) * HEAD_DIM]
                        for hd in range(NUM_HEADS)]).astype(bf16)
        kh = jnp.stack([k[:, hd * HEAD_DIM:(hd + 1) * HEAD_DIM]
                        for hd in range(NUM_HEADS)]).astype(bf16)
        vh = jnp.stack([v[:, hd * HEAD_DIM:(hd + 1) * HEAD_DIM]
                        for hd in range(NUM_HEADS)]).astype(bf16)

        s = jnp.einsum('hqd,hkd->hqk', qh, kh,
                       preferred_element_type=jnp.float32) * scale + bias  # [NH, S, S]
        m = jnp.max(s, axis=-1, keepdims=True)
        e = jnp.exp(s - m)
        p = e * pl.reciprocal(jnp.sum(e, axis=-1, keepdims=True), approx=True)
        ctx = jnp.einsum('hqk,hkd->hqd', p.astype(bf16), vh,
                         preferred_element_type=jnp.float32)               # [NH, S, D]
        ctx = jnp.concatenate([ctx[hd] for hd in range(NUM_HEADS)], axis=-1)  # [S, H]

        attn_out = jnp.dot(ctx.astype(bf16), wo_ref[li],
                           preferred_element_type=jnp.float32) + bo_ref[li]
        h1 = _layer_norm(h + attn_out, g1_ref[li], be1_ref[li])

        # ---- feed-forward ----
        inter = _gelu(jnp.dot(h1.astype(bf16), w1_ref[li],
                              preferred_element_type=jnp.float32) + b1_ref[li])
        ffn = jnp.dot(inter.astype(bf16), w2_ref[li],
                      preferred_element_type=jnp.float32) + b2_ref[li]
        h = _layer_norm(h1 + ffn, g2_ref[li], be2_ref[li])

    # lane-dense write: [S, H] -> [OUT_ROWS, 128] (unmasked vst; reshaped back outside)
    out_ref[0] = _to_lane_dense(h).astype(out_ref.dtype)


# ---------------- wrapper ----------------
def _bytes(*arrays):
    return int(sum(a.size * a.dtype.itemsize for a in arrays))


def pallas_bert_encoder(emb, mask_bias, emb_g, emb_b, lp):
    L = NUM_LAYERS

    def bcast(shape):
        nd = len(shape)
        return pl.BlockSpec(shape, lambda b, _nd=nd: (0,) * _nd)

    in_specs = [
        pl.BlockSpec((1, SEQ, HIDDEN), lambda b: (b, 0, 0)),            # emb
        pl.BlockSpec((1, 1, SEQ), lambda b: (b, 0, 0)),                 # mask bias
        bcast((1, HIDDEN)), bcast((1, HIDDEN)),                         # emb LN gamma / beta
        bcast((L, HIDDEN, 3 * HIDDEN)), bcast((L, 1, 3 * HIDDEN)),      # wqkv / bqkv
        bcast((L, HIDDEN, HIDDEN)), bcast((L, 1, HIDDEN)),              # wo / bo
        bcast((L, 1, HIDDEN)), bcast((L, 1, HIDDEN)),                   # g1 / be1
        bcast((L, HIDDEN, INTERMEDIATE)), bcast((L, 1, INTERMEDIATE)),  # w1 / b1
        bcast((L, INTERMEDIATE, HIDDEN)), bcast((L, 1, HIDDEN)),        # w2 / b2
        bcast((L, 1, HIDDEN)), bcast((L, 1, HIDDEN)),                   # g2 / be2
    ]
    args = (emb, mask_bias, emb_g, emb_b,
            lp["wqkv"], lp["bqkv"], lp["wo"], lp["bo"],
            lp["g1"], lp["be1"], lp["w1"], lp["b1"], lp["w2"], lp["b2"],
            lp["g2"], lp["be2"])

    per_layer_flops = (2 * SEQ * HIDDEN * 3 * HIDDEN              # qkv
                       + 2 * 2 * NUM_HEADS * SEQ * SEQ * HEAD_DIM  # scores + ctx
                       + 2 * SEQ * HIDDEN * HIDDEN                 # wo
                       + 2 * 2 * SEQ * HIDDEN * INTERMEDIATE)      # ffn
    per_layer_trans = NUM_HEADS * SEQ * SEQ + SEQ * INTERMEDIATE + NUM_HEADS * SEQ + 2 * SEQ
    cost = pl.CostEstimate(
        flops=BATCH * NUM_LAYERS * per_layer_flops,
        transcendentals=BATCH * (NUM_LAYERS * per_layer_trans + SEQ),
        bytes_accessed=_bytes(*args) + BATCH * SEQ * HIDDEN * 4)

    out = pl.pallas_call(
        bert_encoder_kernel,
        out_shape=jax.ShapeDtypeStruct((BATCH, OUT_ROWS, LANE), jnp.float32),
        grid=(BATCH,),
        in_specs=in_specs,
        out_specs=pl.BlockSpec((1, OUT_ROWS, LANE), lambda b: (b, 0, 0)),
        compiler_params=pltpu.CompilerParams(
            dimension_semantics=("parallel",),   # batch -> both TensorCores on v7x
            vmem_limit_bytes=32 * 1024 * 1024),
        cost_estimate=cost,
    )(*args)
    return out.reshape(BATCH, SEQ, HIDDEN)


# ---------------- parameter init (deterministic, synthetic, layer-stacked) ----------------
def init_params(key):
    def nrm(k, shape):
        return 0.02 * jax.random.normal(k, shape, jnp.float32)

    keys = jax.random.split(key, 4 + NUM_LAYERS)
    params = {
        "word_emb": nrm(keys[0], (VOCAB, HIDDEN)),
        "pos_emb": nrm(keys[1], (MAX_POS, HIDDEN)),
        "type_emb": nrm(keys[2], (2, HIDDEN)),
        "emb_g": jnp.ones((1, HIDDEN), jnp.float32),
        "emb_b": jnp.zeros((1, HIDDEN), jnp.float32),
    }
    wqkv, wo, w1, w2 = [], [], [], []
    for li in range(NUM_LAYERS):
        ks = jax.random.split(keys[4 + li], 6)
        wqkv.append(jnp.concatenate([nrm(ks[0], (HIDDEN, HIDDEN)),
                                     nrm(ks[1], (HIDDEN, HIDDEN)),
                                     nrm(ks[2], (HIDDEN, HIDDEN))], axis=1))
        wo.append(nrm(ks[3], (HIDDEN, HIDDEN)))
        w1.append(nrm(ks[4], (HIDDEN, INTERMEDIATE)))
        w2.append(nrm(ks[5], (INTERMEDIATE, HIDDEN)))
    L = NUM_LAYERS
    params["layers"] = {
        # MXU matmul weights in bf16 (f32 accumulation in-kernel); biases / LN params in f32.
        "wqkv": jnp.stack(wqkv).astype(jnp.bfloat16),               # [L, H, 3H]
        "bqkv": jnp.zeros((L, 1, 3 * HIDDEN), jnp.float32),
        "wo": jnp.stack(wo).astype(jnp.bfloat16),                   # [L, H, H]
        "bo": jnp.zeros((L, 1, HIDDEN), jnp.float32),
        "g1": jnp.ones((L, 1, HIDDEN), jnp.float32),
        "be1": jnp.zeros((L, 1, HIDDEN), jnp.float32),
        "w1": jnp.stack(w1).astype(jnp.bfloat16),                   # [L, H, I]
        "b1": jnp.zeros((L, 1, INTERMEDIATE), jnp.float32),
        "w2": jnp.stack(w2).astype(jnp.bfloat16),                   # [L, I, H]
        "b2": jnp.zeros((L, 1, HIDDEN), jnp.float32),
        "g2": jnp.ones((L, 1, HIDDEN), jnp.float32),
        "be2": jnp.zeros((L, 1, HIDDEN), jnp.float32),
    }
    return params


# ---------------- forward (BertEncoder.forward equivalent) ----------------
# TODO(synk): BertTokenizer string preprocessing (bertify_input) has no Pallas equivalent;
# token_ids / attn_masks are synthesized directly as integer arrays.
def bert_encoder_forward(params, token_ids, attn_mask):
    B, S = token_ids.shape
    # Embedding gathers stay in plain JAX (XLA fuses them with the adds); everything
    # downstream (embedding LayerNorm + both transformer layers) runs in one Pallas call.
    emb = (jnp.take(params["word_emb"], token_ids, axis=0)
           + params["pos_emb"][jnp.arange(S)][None, :, :]
           + jnp.take(params["type_emb"], jnp.zeros((B, S), jnp.int32), axis=0))
    # additive attention bias over keys, HF-style: (1 - mask) * -10000
    mask_bias = ((1.0 - attn_mask.astype(jnp.float32)) * -10000.0)[:, None, :]   # [B, 1, S]
    cont_reps = pallas_bert_encoder(emb.astype(jnp.float32), mask_bias,
                                    params["emb_g"], params["emb_b"], params["layers"])
    return cont_reps, token_ids


if __name__ == "__main__":
    key = jax.random.PRNGKey(0)
    k_param, k_tok = jax.random.split(key)
    params = init_params(k_param)

    # synthetic "tokenized sentences": batch of 2, seq len 8, with padding
    lengths = jnp.array([8, 5], jnp.int32)
    raw_ids = jax.random.randint(k_tok, (BATCH, SEQ), 1, VOCAB, dtype=jnp.int32)
    pos = jnp.arange(SEQ)[None, :]
    attn_mask = (pos < lengths[:, None]).astype(jnp.int32)        # [BS x S]
    token_ids = jnp.where(attn_mask == 1, raw_ids, PAD_ID)        # [BS x S]

    cont_reps, out_ids = bert_encoder_forward(params, token_ids, attn_mask)
    jax.block_until_ready(cont_reps)
    jax.block_until_ready(out_ids)
    assert cont_reps.shape == (BATCH, SEQ, HIDDEN)
    assert out_ids.shape == (BATCH, SEQ)
    assert bool(jnp.all(jnp.isfinite(cont_reps)))
    print("KERNEL_OK")
</pallas_src>

<mosaic_0001>
module attributes {stable_mosaic.version = 11 : i64} {
  func.func @bert_encoder_kernel(%arg0: i32, %arg1: memref<1x8x32xf32, #tpu.memory_space<vmem>>, %arg2: memref<1x1x8xf32, #tpu.memory_space<vmem>>, %arg3: memref<1x32xf32, #tpu.memory_space<vmem>>, %arg4: memref<1x32xf32, #tpu.memory_space<vmem>>, %arg5: memref<2x32x96xbf16, #tpu.memory_space<vmem>>, %arg6: memref<2x1x96xf32, #tpu.memory_space<vmem>>, %arg7: memref<2x32x32xbf16, #tpu.memory_space<vmem>>, %arg8: memref<2x1x32xf32, #tpu.memory_space<vmem>>, %arg9: memref<2x1x32xf32, #tpu.memory_space<vmem>>, %arg10: memref<2x1x32xf32, #tpu.memory_space<vmem>>, %arg11: memref<2x32x64xbf16, #tpu.memory_space<vmem>>, %arg12: memref<2x1x64xf32, #tpu.memory_space<vmem>>, %arg13: memref<2x64x32xbf16, #tpu.memory_space<vmem>>, %arg14: memref<2x1x32xf32, #tpu.memory_space<vmem>>, %arg15: memref<2x1x32xf32, #tpu.memory_space<vmem>>, %arg16: memref<2x1x32xf32, #tpu.memory_space<vmem>>, %arg17: memref<1x2x128xf32, #tpu.memory_space<vmem>>) attributes {dimension_semantics = [#tpu.dimension_semantics<parallel>], iteration_bounds = array<i64: 2>, scalar_prefetch = 0 : i64, scratch_operands = 0 : i64, tpu.core_type = #tpu.core_type<tc>, window_params = [{transform_indices = @transform_0, window_bounds = array<i64: 1, 8, 32>}, {transform_indices = @transform_1, window_bounds = array<i64: 1, 1, 8>}, {pipeline_mode = #tpu.pipeline_mode<synchronous>, transform_indices = @transform_2, window_bounds = array<i64: 1, 32>}, {pipeline_mode = #tpu.pipeline_mode<synchronous>, transform_indices = @transform_3, window_bounds = array<i64: 1, 32>}, {pipeline_mode = #tpu.pipeline_mode<synchronous>, transform_indices = @transform_4, window_bounds = array<i64: 2, 32, 96>}, {pipeline_mode = #tpu.pipeline_mode<synchronous>, transform_indices = @transform_5, window_bounds = array<i64: 2, 1, 96>}, {pipeline_mode = #tpu.pipeline_mode<synchronous>, transform_indices = @transform_6, window_bounds = array<i64: 2, 32, 32>}, {pipeline_mode = #tpu.pipeline_mode<synchronous>, transform_indices = @transform_7, window_bounds = array<i64: 2, 1, 32>}, {pipeline_mode = #tpu.pipeline_mode<synchronous>, transform_indices = @transform_8, window_bounds = array<i64: 2, 1, 32>}, {pipeline_mode = #tpu.pipeline_mode<synchronous>, transform_indices = @transform_9, window_bounds = array<i64: 2, 1, 32>}, {pipeline_mode = #tpu.pipeline_mode<synchronous>, transform_indices = @transform_10, window_bounds = array<i64: 2, 32, 64>}, {pipeline_mode = #tpu.pipeline_mode<synchronous>, transform_indices = @transform_11, window_bounds = array<i64: 2, 1, 64>}, {pipeline_mode = #tpu.pipeline_mode<synchronous>, transform_indices = @transform_12, window_bounds = array<i64: 2, 64, 32>}, {pipeline_mode = #tpu.pipeline_mode<synchronous>, transform_indices = @transform_13, window_bounds = array<i64: 2, 1, 32>}, {pipeline_mode = #tpu.pipeline_mode<synchronous>, transform_indices = @transform_14, window_bounds = array<i64: 2, 1, 32>}, {pipeline_mode = #tpu.pipeline_mode<synchronous>, transform_indices = @transform_15, window_bounds = array<i64: 2, 1, 32>}, {transform_indices = @transform_16, window_bounds = array<i64: 1, 2, 128>}]} {
    %c0 = arith.constant 0 : index
    %c0_0 = arith.constant 0 : index
    %c0_1 = arith.constant 0 : index
    %0 = vector.load %arg2[%c0, %c0_0, %c0_1] : memref<1x1x8xf32, #tpu.memory_space<vmem>>, vector<1x1x8xf32>
    %1 = vector.shape_cast %0 : vector<1x1x8xf32> to vector<1x8xf32>
    %c0_2 = arith.constant 0 : index
    %c0_3 = arith.constant 0 : index
    %c0_4 = arith.constant 0 : index
    %2 = vector.load %arg1[%c0_2, %c0_3, %c0_4] : memref<1x8x32xf32, #tpu.memory_space<vmem>>, vector<1x8x32xf32>
    %3 = vector.shape_cast %2 : vector<1x8x32xf32> to vector<8x32xf32>
    %c0_5 = arith.constant 0 : index
    %c0_6 = arith.constant 0 : index
    %4 = vector.load %arg3[%c0_5, %c0_6] : memref<1x32xf32, #tpu.memory_space<vmem>>, vector<1x32xf32>
    %c0_7 = arith.constant 0 : index
    %c0_8 = arith.constant 0 : index
    %5 = vector.load %arg4[%c0_7, %c0_8] : memref<1x32xf32, #tpu.memory_space<vmem>>, vector<1x32xf32>
    %cst = arith.constant dense<0.000000e+00> : vector<8xf32>
    %6 = vector.multi_reduction <add>, %3, %cst [1] : vector<8x32xf32> to vector<8xf32>
    %7 = vector.shape_cast %6 : vector<8xf32> to vector<8x1xf32>
    %cst_9 = arith.constant 3.200000e+01 : f32
    %8 = vector.broadcast %cst_9 : f32 to vector<8x1xf32>
    %9 = arith.divf %7, %8 : vector<8x1xf32>
    %10 = vector.broadcast %9 : vector<8x1xf32> to vector<8x32xf32>
    %11 = arith.subf %3, %10 : vector<8x32xf32>
    %12 = arith.mulf %11, %11 : vector<8x32xf32>
    %cst_10 = arith.constant dense<0.000000e+00> : vector<8xf32>
    %13 = vector.multi_reduction <add>, %12, %cst_10 [1] : vector<8x32xf32> to vector<8xf32>
    %14 = vector.shape_cast %13 : vector<8xf32> to vector<8x1xf32>
    %cst_11 = arith.constant 3.200000e+01 : f32
    %15 = vector.broadcast %cst_11 : f32 to vector<8x1xf32>
    %16 = arith.divf %14, %15 : vector<8x1xf32>
    %17 = vector.broadcast %9 : vector<8x1xf32> to vector<8x32xf32>
    %18 = arith.subf %3, %17 : vector<8x32xf32>
    %cst_12 = arith.constant 9.99999996E-13 : f32
    %19 = vector.broadcast %cst_12 : f32 to vector<8x1xf32>
    %20 = arith.addf %16, %19 : vector<8x1xf32>
    %21 = math.rsqrt %20 : vector<8x1xf32>
    %22 = vector.broadcast %21 : vector<8x1xf32> to vector<8x32xf32>
    %23 = arith.mulf %18, %22 : vector<8x32xf32>
    %24 = vector.broadcast %4 : vector<1x32xf32> to vector<8x32xf32>
    %25 = arith.mulf %23, %24 : vector<8x32xf32>
    %26 = vector.broadcast %5 : vector<1x32xf32> to vector<8x32xf32>
    %27 = arith.addf %25, %26 : vector<8x32xf32>
    %28 = arith.truncf %27 : vector<8x32xf32> to vector<8x32xbf16>
    %c0_13 = arith.constant 0 : index
    %c0_14 = arith.constant 0 : index
    %c0_15 = arith.constant 0 : index
    %29 = vector.load %arg5[%c0_13, %c0_14, %c0_15] : memref<2x32x96xbf16, #tpu.memory_space<vmem>>, vector<1x32x96xbf16>
    %30 = vector.shape_cast %29 : vector<1x32x96xbf16> to vector<32x96xbf16>
    %cst_16 = arith.constant dense<0.000000e+00> : vector<8x96xf32>
    %31 = tpu.matmul %28, %30, %cst_16 {dimension_numbers = #tpu.dot_dimension_numbers<[1], [0], [0], [1], [0, 0, 1, 1], [], []>} : vector<8x32xbf16>, vector<32x96xbf16>, vector<8x96xf32> -> vector<8x96xf32>
    %c0_17 = arith.constant 0 : index
    %c0_18 = arith.constant 0 : index
    %c0_19 = arith.constant 0 : index
    %32 = vector.load %arg6[%c0_17, %c0_18, %c0_19] : memref<2x1x96xf32, #tpu.memory_space<vmem>>, vector<1x1x96xf32>
    %33 = vector.shape_cast %32 : vector<1x1x96xf32> to vector<1x96xf32>
    %34 = vector.broadcast %33 : vector<1x96xf32> to vector<8x96xf32>
    %35 = arith.addf %31, %34 : vector<8x96xf32>
    %36 = vector.extract_strided_slice %35 {offsets = [0, 0], sizes = [8, 32], strides = [1, 1]} : vector<8x96xf32> to vector<8x32xf32>
    %37 = vector.extract_strided_slice %35 {offsets = [0, 32], sizes = [8, 32], strides = [1, 1]} : vector<8x96xf32> to vector<8x32xf32>
    %38 = vector.extract_strided_slice %35 {offsets = [0, 64], sizes = [8, 32], strides = [1, 1]} : vector<8x96xf32> to vector<8x32xf32>
    %39 = vector.extract_strided_slice %36 {offsets = [0, 0], sizes = [8, 16], strides = [1, 1]} : vector<8x32xf32> to vector<8x16xf32>
    %40 = vector.extract_strided_slice %36 {offsets = [0, 16], sizes = [8, 16], strides = [1, 1]} : vector<8x32xf32> to vector<8x16xf32>
    %41 = vector.shape_cast %39 : vector<8x16xf32> to vector<1x8x16xf32>
    %42 = vector.shape_cast %40 : vector<8x16xf32> to vector<1x8x16xf32>
    %43 = tpu.concatenate %41, %42 in 0 : vector<1x8x16xf32>, vector<1x8x16xf32> -> vector<2x8x16xf32>
    %44 = arith.truncf %43 : vector<2x8x16xf32> to vector<2x8x16xbf16>
    %45 = vector.extract_strided_slice %37 {offsets = [0, 0], sizes = [8, 16], strides = [1, 1]} : vector<8x32xf32> to vector<8x16xf32>
    %46 = vector.extract_strided_slice %37 {offsets = [0, 16], sizes = [8, 16], strides = [1, 1]} : vector<8x32xf32> to vector<8x16xf32>
    %47 = vector.shape_cast %45 : vector<8x16xf32> to vector<1x8x16xf32>
    %48 = vector.shape_cast %46 : vector<8x16xf32> to vector<1x8x16xf32>
    %49 = tpu.concatenate %47, %48 in 0 : vector<1x8x16xf32>, vector<1x8x16xf32> -> vector<2x8x16xf32>
    %50 = arith.truncf %49 : vector<2x8x16xf32> to vector<2x8x16xbf16>
    %51 = vector.extract_strided_slice %38 {offsets = [0, 0], sizes = [8, 16], strides = [1, 1]} : vector<8x32xf32> to vector<8x16xf32>
    %52 = vector.extract_strided_slice %38 {offsets = [0, 16], sizes = [8, 16], strides = [1, 1]} : vector<8x32xf32> to vector<8x16xf32>
    %53 = vector.shape_cast %51 : vector<8x16xf32> to vector<1x8x16xf32>
    %54 = vector.shape_cast %52 : vector<8x16xf32> to vector<1x8x16xf32>
    %55 = tpu.concatenate %53, %54 in 0 : vector<1x8x16xf32>, vector<1x8x16xf32> -> vector<2x8x16xf32>
    %56 = arith.truncf %55 : vector<2x8x16xf32> to vector<2x8x16xbf16>
    "tpu.trace_start"() <{level = 10 : i32, message = "hqd,hkd->hqk"}> : () -> ()
    %cst_20 = arith.constant dense<0.000000e+00> : vector<2x8x8xf32>
    %57 = tpu.matmul %44, %50, %cst_20 {dimension_numbers = #tpu.dot_dimension_numbers<[2], [2], [1], [1], [0, 0, 0, 1, 1, 1], [0], [0]>} : vector<2x8x16xbf16>, vector<2x8x16xbf16>, vector<2x8x8xf32> -> vector<2x8x8xf32>
    "tpu.trace_stop"() : () -> ()
    %cst_21 = arith.constant 2.500000e-01 : f32
    %58 = vector.broadcast %cst_21 : f32 to vector<2x8x8xf32>
    %59 = arith.mulf %57, %58 : vector<2x8x8xf32>
    %60 = vector.shape_cast %1 : vector<1x8xf32> to vector<1x1x8xf32>
    %61 = vector.broadcast %60 : vector<1x1x8xf32> to vector<2x8x8xf32>
    %62 = arith.addf %59, %61 : vector<2x8x8xf32>
    %cst_22 = arith.constant dense<0xFF800000> : vector<2x8xf32>
    %63 = vector.multi_reduction <maximumf>, %62, %cst_22 [2] : vector<2x8x8xf32> to vector<2x8xf32>
    %64 = vector.shape_cast %63 : vector<2x8xf32> to vector<2x8x1xf32>
    %65 = vector.broadcast %64 : vector<2x8x1xf32> to vector<2x8x8xf32>
    %66 = arith.subf %62, %65 : vector<2x8x8xf32>
    %67 = math.exp %66 : vector<2x8x8xf32>
    %cst_23 = arith.constant dense<0.000000e+00> : vector<2x8xf32>
    %68 = vector.multi_reduction <add>, %67, %cst_23 [2] : vector<2x8x8xf32> to vector<2x8xf32>
    %69 = vector.shape_cast %68 : vector<2x8xf32> to vector<2x8x1xf32>
    %70 = tpu.reciprocal %69 {approx = true} : vector<2x8x1xf32> -> vector<2x8x1xf32>
    %71 = vector.broadcast %70 : vector<2x8x1xf32> to vector<2x8x8xf32>
    %72 = arith.mulf %67, %71 : vector<2x8x8xf32>
    %73 = arith.truncf %72 : vector<2x8x8xf32> to vector<2x8x8xbf16>
    "tpu.trace_start"() <{level = 10 : i32, message = "hqk,hkd->hqd"}> : () -> ()
    %cst_24 = arith.constant dense<0.000000e+00> : vector<2x8x16xf32>
    %74 = tpu.matmul %73, %56, %cst_24 {dimension_numbers = #tpu.dot_dimension_numbers<[2], [1], [1], [2], [0, 0, 0, 1, 1, 2], [0], [0]>} : vector<2x8x8xbf16>, vector<2x8x16xbf16>, vector<2x8x16xf32> -> vector<2x8x16xf32>
    "tpu.trace_stop"() : () -> ()
    %75 = vector.extract_strided_slice %74 {offsets = [0, 0, 0], sizes = [1, 8, 16], strides = [1, 1, 1]} : vector<2x8x16xf32> to vector<1x8x16xf32>
    %76 = vector.shape_cast %75 : vector<1x8x16xf32> to vector<8x16xf32>
    %77 = vector.extract_strided_slice %74 {offsets = [1, 0, 0], sizes = [1, 8, 16], strides = [1, 1, 1]} : vector<2x8x16xf32> to vector<1x8x16xf32>
    %78 = vector.shape_cast %77 : vector<1x8x16xf32> to vector<8x16xf32>
    %79 = tpu.concatenate %76, %78 in 1 : vector<8x16xf32>, vector<8x16xf32> -> vector<8x32xf32>
    %80 = arith.truncf %79 : vector<8x32xf32> to vector<8x32xbf16>
    %c0_25 = arith.constant 0 : index
    %c0_26 = arith.constant 0 : index
    %c0_27 = arith.constant 0 : index
    %81 = vector.load %arg7[%c0_25, %c0_26, %c0_27] : memref<2x32x32xbf16, #tpu.memory_space<vmem>>, vector<1x32x32xbf16>
    %82 = vector.shape_cast %81 : vector<1x32x32xbf16> to vector<32x32xbf16>
    %cst_28 = arith.constant dense<0.000000e+00> : vector<8x32xf32>
    %83 = tpu.matmul %80, %82, %cst_28 {dimension_numbers = #tpu.dot_dimension_numbers<[1], [0], [0], [1], [0, 0, 1, 1], [], []>} : vector<8x32xbf16>, vector<32x32xbf16>, vector<8x32xf32> -> vector<8x32xf32>
    %c0_29 = arith.constant 0 : index
    %c0_30 = arith.constant 0 : index
    %c0_31 = arith.constant 0 : index
    %84 = vector.load %arg8[%c0_29, %c0_30, %c0_31] : memref<2x1x32xf32, #tpu.memory_space<vmem>>, vector<1x1x32xf32>
    %85 = vector.shape_cast %84 : vector<1x1x32xf32> to vector<1x32xf32>
    %86 = vector.broadcast %85 : vector<1x32xf32> to vector<8x32xf32>
    %87 = arith.addf %83, %86 : vector<8x32xf32>
    %88 = arith.addf %27, %87 : vector<8x32xf32>
    %c0_32 = arith.constant 0 : index
    %c0_33 = arith.constant 0 : index
    %c0_34 = arith.constant 0 : index
    %89 = vector.load %arg9[%c0_32, %c0_33, %c0_34] : memref<2x1x32xf32, #tpu.memory_space<vmem>>, vector<1x1x32xf32>
    %90 = vector.shape_cast %89 : vector<1x1x32xf32> to vector<1x32xf32>
    %c0_35 = arith.constant 0 : index
    %c0_36 = arith.constant 0 : index
    %c0_37 = arith.constant 0 : index
    %91 = vector.load %arg10[%c0_35, %c0_36, %c0_37] : memref<2x1x32xf32, #tpu.memory_space<vmem>>, vector<1x1x32xf32>
    %92 = vector.shape_cast %91 : vector<1x1x32xf32> to vector<1x32xf32>
    %cst_38 = arith.constant dense<0.000000e+00> : vector<8xf32>
    %93 = vector.multi_reduction <add>, %88, %cst_38 [1] : vector<8x32xf32> to vector<8xf32>
    %94 = vector.shape_cast %93 : vector<8xf32> to vector<8x1xf32>
    %cst_39 = arith.constant 3.200000e+01 : f32
    %95 = vector.broadcast %cst_39 : f32 to vector<8x1xf32>
    %96 = arith.divf %94, %95 : vector<8x1xf32>
    %97 = vector.broadcast %96 : vector<8x1xf32> to vector<8x32xf32>
    %98 = arith.subf %88, %97 : vector<8x32xf32>
    %99 = arith.mulf %98, %98 : vector<8x32xf32>
    %cst_40 = arith.constant dense<0.000000e+00> : vector<8xf32>
    %100 = vector.multi_reduction <add>, %99, %cst_40 [1] : vector<8x32xf32> to vector<8xf32>
    %101 = vector.shape_cast %100 : vector<8xf32> to vector<8x1xf32>
    %cst_41 = arith.constant 3.200000e+01 : f32
    %102 = vector.broadcast %cst_41 : f32 to vector<8x1xf32>
    %103 = arith.divf %101, %102 : vector<8x1xf32>
    %104 = vector.broadcast %96 : vector<8x1xf32> to vector<8x32xf32>
    %105 = arith.subf %88, %104 : vector<8x32xf32>
    %cst_42 = arith.constant 9.99999996E-13 : f32
    %106 = vector.broadcast %cst_42 : f32 to vector<8x1xf32>
    %107 = arith.addf %103, %106 : vector<8x1xf32>
    %108 = math.rsqrt %107 : vector<8x1xf32>
    %109 = vector.broadcast %108 : vector<8x1xf32> to vector<8x32xf32>
    %110 = arith.mulf %105, %109 : vector<8x32xf32>
    %111 = vector.broadcast %90 : vector<1x32xf32> to vector<8x32xf32>
    %112 = arith.mulf %110, %111 : vector<8x32xf32>
    %113 = vector.broadcast %92 : vector<1x32xf32> to vector<8x32xf32>
    %114 = arith.addf %112, %113 : vector<8x32xf32>
    %115 = arith.truncf %114 : vector<8x32xf32> to vector<8x32xbf16>
    %c0_43 = arith.constant 0 : index
    %c0_44 = arith.constant 0 : index
    %c0_45 = arith.constant 0 : index
    %116 = vector.load %arg11[%c0_43, %c0_44, %c0_45] : memref<2x32x64xbf16, #tpu.memory_space<vmem>>, vector<1x32x64xbf16>
    %117 = vector.shape_cast %116 : vector<1x32x64xbf16> to vector<32x64xbf16>
    %cst_46 = arith.constant dense<0.000000e+00> : vector<8x64xf32>
    %118 = tpu.matmul %115, %117, %cst_46 {dimension_numbers = #tpu.dot_dimension_numbers<[1], [0], [0], [1], [0, 0, 1, 1], [], []>} : vector<8x32xbf16>, vector<32x64xbf16>, vector<8x64xf32> -> vector<8x64xf32>
    %c0_47 = arith.constant 0 : index
    %c0_48 = arith.constant 0 : index
    %c0_49 = arith.constant 0 : index
    %119 = vector.load %arg12[%c0_47, %c0_48, %c0_49] : memref<2x1x64xf32, #tpu.memory_space<vmem>>, vector<1x1x64xf32>
    %120 = vector.shape_cast %119 : vector<1x1x64xf32> to vector<1x64xf32>
    %121 = vector.broadcast %120 : vector<1x64xf32> to vector<8x64xf32>
    %122 = arith.addf %118, %121 : vector<8x64xf32>
    %cst_50 = arith.constant 5.000000e-01 : f32
    %123 = vector.broadcast %cst_50 : f32 to vector<8x64xf32>
    %124 = arith.mulf %123, %122 : vector<8x64xf32>
    %cst_51 = arith.constant 4.471500e-02 : f32
    %125 = vector.broadcast %cst_51 : f32 to vector<8x64xf32>
    %126 = arith.mulf %125, %122 : vector<8x64xf32>
    %127 = arith.mulf %126, %122 : vector<8x64xf32>
    %128 = arith.mulf %127, %122 : vector<8x64xf32>
    %129 = arith.addf %122, %128 : vector<8x64xf32>
    %cst_52 = arith.constant 0.797884583 : f32
    %130 = vector.broadcast %cst_52 : f32 to vector<8x64xf32>
    %131 = arith.mulf %130, %129 : vector<8x64xf32>
    %132 = math.tanh %131 : vector<8x64xf32>
    %cst_53 = arith.constant 1.000000e+00 : f32
    %133 = vector.broadcast %cst_53 : f32 to vector<8x64xf32>
    %134 = arith.addf %133, %132 : vector<8x64xf32>
    %135 = arith.mulf %124, %134 : vector<8x64xf32>
    %136 = arith.truncf %135 : vector<8x64xf32> to vector<8x64xbf16>
    %c0_54 = arith.constant 0 : index
    %c0_55 = arith.constant 0 : index
    %c0_56 = arith.constant 0 : index
    %137 = vector.load %arg13[%c0_54, %c0_55, %c0_56] : memref<2x64x32xbf16, #tpu.memory_space<vmem>>, vector<1x64x32xbf16>
    %138 = vector.shape_cast %137 : vector<1x64x32xbf16> to vector<64x32xbf16>
    %cst_57 = arith.constant dense<0.000000e+00> : vector<8x32xf32>
    %139 = tpu.matmul %136, %138, %cst_57 {dimension_numbers = #tpu.dot_dimension_numbers<[1], [0], [0], [1], [0, 0, 1, 1], [], []>} : vector<8x64xbf16>, vector<64x32xbf16>, vector<8x32xf32> -> vector<8x32xf32>
    %c0_58 = arith.constant 0 : index
    %c0_59 = arith.constant 0 : index
    %c0_60 = arith.constant 0 : index
    %140 = vector.load %arg14[%c0_58, %c0_59, %c0_60] : memref<2x1x32xf32, #tpu.memory_space<vmem>>, vector<1x1x32xf32>
    %141 = vector.shape_cast %140 : vector<1x1x32xf32> to vector<1x32xf32>
    %142 = vector.broadcast %141 : vector<1x32xf32> to vector<8x32xf32>
    %143 = arith.addf %139, %142 : vector<8x32xf32>
    %144 = arith.addf %114, %143 : vector<8x32xf32>
    %c0_61 = arith.constant 0 : index
    %c0_62 = arith.constant 0 : index
    %c0_63 = arith.constant 0 : index
    %145 = vector.load %arg15[%c0_61, %c0_62, %c0_63] : memref<2x1x32xf32, #tpu.memory_space<vmem>>, vector<1x1x32xf32>
    %146 = vector.shape_cast %145 : vector<1x1x32xf32> to vector<1x32xf32>
    %c0_64 = arith.constant 0 : index
    %c0_65 = arith.constant 0 : index
    %c0_66 = arith.constant 0 : index
    %147 = vector.load %arg16[%c0_64, %c0_65, %c0_66] : memref<2x1x32xf32, #tpu.memory_space<vmem>>, vector<1x1x32xf32>
    %148 = vector.shape_cast %147 : vector<1x1x32xf32> to vector<1x32xf32>
    %cst_67 = arith.constant dense<0.000000e+00> : vector<8xf32>
    %149 = vector.multi_reduction <add>, %144, %cst_67 [1] : vector<8x32xf32> to vector<8xf32>
    %150 = vector.shape_cast %149 : vector<8xf32> to vector<8x1xf32>
    %cst_68 = arith.constant 3.200000e+01 : f32
    %151 = vector.broadcast %cst_68 : f32 to vector<8x1xf32>
    %152 = arith.divf %150, %151 : vector<8x1xf32>
    %153 = vector.broadcast %152 : vector<8x1xf32> to vector<8x32xf32>
    %154 = arith.subf %144, %153 : vector<8x32xf32>
    %155 = arith.mulf %154, %154 : vector<8x32xf32>
    %cst_69 = arith.constant dense<0.000000e+00> : vector<8xf32>
    %156 = vector.multi_reduction <add>, %155, %cst_69 [1] : vector<8x32xf32> to vector<8xf32>
    %157 = vector.shape_cast %156 : vector<8xf32> to vector<8x1xf32>
    %cst_70 = arith.constant 3.200000e+01 : f32
    %158 = vector.broadcast %cst_70 : f32 to vector<8x1xf32>
    %159 = arith.divf %157, %158 : vector<8x1xf32>
    %160 = vector.broadcast %152 : vector<8x1xf32> to vector<8x32xf32>
    %161 = arith.subf %144, %160 : vector<8x32xf32>
    %cst_71 = arith.constant 9.99999996E-13 : f32
    %162 = vector.broadcast %cst_71 : f32 to vector<8x1xf32>
    %163 = arith.addf %159, %162 : vector<8x1xf32>
    %164 = math.rsqrt %163 : vector<8x1xf32>
    %165 = vector.broadcast %164 : vector<8x1xf32> to vector<8x32xf32>
    %166 = arith.mulf %161, %165 : vector<8x32xf32>
    %167 = vector.broadcast %146 : vector<1x32xf32> to vector<8x32xf32>
    %168 = arith.mulf %166, %167 : vector<8x32xf32>
    %169 = vector.broadcast %148 : vector<1x32xf32> to vector<8x32xf32>
    %170 = arith.addf %168, %169 : vector<8x32xf32>
    %171 = arith.truncf %170 : vector<8x32xf32> to vector<8x32xbf16>
    %c1 = arith.constant 1 : index
    %c0_72 = arith.constant 0 : index
    %c0_73 = arith.constant 0 : index
    %172 = vector.load %arg5[%c1, %c0_72, %c0_73] : memref<2x32x96xbf16, #tpu.memory_space<vmem>>, vector<1x32x96xbf16>
    %173 = vector.shape_cast %172 : vector<1x32x96xbf16> to vector<32x96xbf16>
    %cst_74 = arith.constant dense<0.000000e+00> : vector<8x96xf32>
    %174 = tpu.matmul %171, %173, %cst_74 {dimension_numbers = #tpu.dot_dimension_numbers<[1], [0], [0], [1], [0, 0, 1, 1], [], []>} : vector<8x32xbf16>, vector<32x96xbf16>, vector<8x96xf32> -> vector<8x96xf32>
    %c1_75 = arith.constant 1 : index
    %c0_76 = arith.constant 0 : index
    %c0_77 = arith.constant 0 : index
    %175 = vector.load %arg6[%c1_75, %c0_76, %c0_77] : memref<2x1x96xf32, #tpu.memory_space<vmem>>, vector<1x1x96xf32>
    %176 = vector.shape_cast %175 : vector<1x1x96xf32> to vector<1x96xf32>
    %177 = vector.broadcast %176 : vector<1x96xf32> to vector<8x96xf32>
    %178 = arith.addf %174, %177 : vector<8x96xf32>
    %179 = vector.extract_strided_slice %178 {offsets = [0, 0], sizes = [8, 32], strides = [1, 1]} : vector<8x96xf32> to vector<8x32xf32>
    %180 = vector.extract_strided_slice %178 {offsets = [0, 32], sizes = [8, 32], strides = [1, 1]} : vector<8x96xf32> to vector<8x32xf32>
    %181 = vector.extract_strided_slice %178 {offsets = [0, 64], sizes = [8, 32], strides = [1, 1]} : vector<8x96xf32> to vector<8x32xf32>
    %182 = vector.extract_strided_slice %179 {offsets = [0, 0], sizes = [8, 16], strides = [1, 1]} : vector<8x32xf32> to vector<8x16xf32>
    %183 = vector.extract_strided_slice %179 {offsets = [0, 16], sizes = [8, 16], strides = [1, 1]} : vector<8x32xf32> to vector<8x16xf32>
    %184 = vector.shape_cast %182 : vector<8x16xf32> to vector<1x8x16xf32>
    %185 = vector.shape_cast %183 : vector<8x16xf32> to vector<1x8x16xf32>
    %186 = tpu.concatenate %184, %185 in 0 : vector<1x8x16xf32>, vector<1x8x16xf32> -> vector<2x8x16xf32>
    %187 = arith.truncf %186 : vector<2x8x16xf32> to vector<2x8x16xbf16>
    %188 = vector.extract_strided_slice %180 {offsets = [0, 0], sizes = [8, 16], strides = [1, 1]} : vector<8x32xf32> to vector<8x16xf32>
    %189 = vector.extract_strided_slice %180 {offsets = [0, 16], sizes = [8, 16], strides = [1, 1]} : vector<8x32xf32> to vector<8x16xf32>
    %190 = vector.shape_cast %188 : vector<8x16xf32> to vector<1x8x16xf32>
    %191 = vector.shape_cast %189 : vector<8x16xf32> to vector<1x8x16xf32>
    %192 = tpu.concatenate %190, %191 in 0 : vector<1x8x16xf32>, vector<1x8x16xf32> -> vector<2x8x16xf32>
    %193 = arith.truncf %192 : vector<2x8x16xf32> to vector<2x8x16xbf16>
    %194 = vector.extract_strided_slice %181 {offsets = [0, 0], sizes = [8, 16], strides = [1, 1]} : vector<8x32xf32> to vector<8x16xf32>
    %195 = vector.extract_strided_slice %181 {offsets = [0, 16], sizes = [8, 16], strides = [1, 1]} : vector<8x32xf32> to vector<8x16xf32>
    %196 = vector.shape_cast %194 : vector<8x16xf32> to vector<1x8x16xf32>
    %197 = vector.shape_cast %195 : vector<8x16xf32> to vector<1x8x16xf32>
    %198 = tpu.concatenate %196, %197 in 0 : vector<1x8x16xf32>, vector<1x8x16xf32> -> vector<2x8x16xf32>
    %199 = arith.truncf %198 : vector<2x8x16xf32> to vector<2x8x16xbf16>
    "tpu.trace_start"() <{level = 10 : i32, message = "hqd,hkd->hqk"}> : () -> ()
    %cst_78 = arith.constant dense<0.000000e+00> : vector<2x8x8xf32>
    %200 = tpu.matmul %187, %193, %cst_78 {dimension_numbers = #tpu.dot_dimension_numbers<[2], [2], [1], [1], [0, 0, 0, 1, 1, 1], [0], [0]>} : vector<2x8x16xbf16>, vector<2x8x16xbf16>, vector<2x8x8xf32> -> vector<2x8x8xf32>
    "tpu.trace_stop"() : () -> ()
    %cst_79 = arith.constant 2.500000e-01 : f32
    %201 = vector.broadcast %cst_79 : f32 to vector<2x8x8xf32>
    %202 = arith.mulf %200, %201 : vector<2x8x8xf32>
    %203 = vector.shape_cast %1 : vector<1x8xf32> to vector<1x1x8xf32>
    %204 = vector.broadcast %203 : vector<1x1x8xf32> to vector<2x8x8xf32>
    %205 = arith.addf %202, %204 : vector<2x8x8xf32>
    %cst_80 = arith.constant dense<0xFF800000> : vector<2x8xf32>
    %206 = vector.multi_reduction <maximumf>, %205, %cst_80 [2] : vector<2x8x8xf32> to vector<2x8xf32>
    %207 = vector.shape_cast %206 : vector<2x8xf32> to vector<2x8x1xf32>
    %208 = vector.broadcast %207 : vector<2x8x1xf32> to vector<2x8x8xf32>
    %209 = arith.subf %205, %208 : vector<2x8x8xf32>
    %210 = math.exp %209 : vector<2x8x8xf32>
    %cst_81 = arith.constant dense<0.000000e+00> : vector<2x8xf32>
    %211 = vector.multi_reduction <add>, %210, %cst_81 [2] : vector<2x8x8xf32> to vector<2x8xf32>
    %212 = vector.shape_cast %211 : vector<2x8xf32> to vector<2x8x1xf32>
    %213 = tpu.reciprocal %212 {approx = true} : vector<2x8x1xf32> -> vector<2x8x1xf32>
    %214 = vector.broadcast %213 : vector<2x8x1xf32> to vector<2x8x8xf32>
    %215 = arith.mulf %210, %214 : vector<2x8x8xf32>
    %216 = arith.truncf %215 : vector<2x8x8xf32> to vector<2x8x8xbf16>
    "tpu.trace_start"() <{level = 10 : i32, message = "hqk,hkd->hqd"}> : () -> ()
    %cst_82 = arith.constant dense<0.000000e+00> : vector<2x8x16xf32>
    %217 = tpu.matmul %216, %199, %cst_82 {dimension_numbers = #tpu.dot_dimension_numbers<[2], [1], [1], [2], [0, 0, 0, 1, 1, 2], [0], [0]>} : vector<2x8x8xbf16>, vector<2x8x16xbf16>, vector<2x8x16xf32> -> vector<2x8x16xf32>
    "tpu.trace_stop"() : () -> ()
    %218 = vector.extract_strided_slice %217 {offsets = [0, 0, 0], sizes = [1, 8, 16], strides = [1, 1, 1]} : vector<2x8x16xf32> to vector<1x8x16xf32>
    %219 = vector.shape_cast %218 : vector<1x8x16xf32> to vector<8x16xf32>
    %220 = vector.extract_strided_slice %217 {offsets = [1, 0, 0], sizes = [1, 8, 16], strides = [1, 1, 1]} : vector<2x8x16xf32> to vector<1x8x16xf32>
    %221 = vector.shape_cast %220 : vector<1x8x16xf32> to vector<8x16xf32>
    %222 = tpu.concatenate %219, %221 in 1 : vector<8x16xf32>, vector<8x16xf32> -> vector<8x32xf32>
    %223 = arith.truncf %222 : vector<8x32xf32> to vector<8x32xbf16>
    %c1_83 = arith.constant 1 : index
    %c0_84 = arith.constant 0 : index
    %c0_85 = arith.constant 0 : index
    %224 = vector.load %arg7[%c1_83, %c0_84, %c0_85] : memref<2x32x32xbf16, #tpu.memory_space<vmem>>, vector<1x32x32xbf16>
    %225 = vector.shape_cast %224 : vector<1x32x32xbf16> to vector<32x32xbf16>
    %cst_86 = arith.constant dense<0.000000e+00> : vector<8x32xf32>
    %226 = tpu.matmul %223, %225, %cst_86 {dimension_numbers = #tpu.dot_dimension_numbers<[1], [0], [0], [1], [0, 0, 1, 1], [], []>} : vector<8x32xbf16>, vector<32x32xbf16>, vector<8x32xf32> -> vector<8x32xf32>
    %c1_87 = arith.constant 1 : index
    %c0_88 = arith.constant 0 : index
    %c0_89 = arith.constant 0 : index
    %227 = vector.load %arg8[%c1_87, %c0_88, %c0_89] : memref<2x1x32xf32, #tpu.memory_space<vmem>>, vector<1x1x32xf32>
    %228 = vector.shape_cast %227 : vector<1x1x32xf32> to vector<1x32xf32>
    %229 = vector.broadcast %228 : vector<1x32xf32> to vector<8x32xf32>
    %230 = arith.addf %226, %229 : vector<8x32xf32>
    %231 = arith.addf %170, %230 : vector<8x32xf32>
    %c1_90 = arith.constant 1 : index
    %c0_91 = arith.constant 0 : index
    %c0_92 = arith.constant 0 : index
    %232 = vector.load %arg9[%c1_90, %c0_91, %c0_92] : memref<2x1x32xf32, #tpu.memory_space<vmem>>, vector<1x1x32xf32>
    %233 = vector.shape_cast %232 : vector<1x1x32xf32> to vector<1x32xf32>
    %c1_93 = arith.constant 1 : index
    %c0_94 = arith.constant 0 : index
    %c0_95 = arith.constant 0 : index
    %234 = vector.load %arg10[%c1_93, %c0_94, %c0_95] : memref<2x1x32xf32, #tpu.memory_space<vmem>>, vector<1x1x32xf32>
    %235 = vector.shape_cast %234 : vector<1x1x32xf32> to vector<1x32xf32>
    %cst_96 = arith.constant dense<0.000000e+00> : vector<8xf32>
    %236 = vector.multi_reduction <add>, %231, %cst_96 [1] : vector<8x32xf32> to vector<8xf32>
    %237 = vector.shape_cast %236 : vector<8xf32> to vector<8x1xf32>
    %cst_97 = arith.constant 3.200000e+01 : f32
    %238 = vector.broadcast %cst_97 : f32 to vector<8x1xf32>
    %239 = arith.divf %237, %238 : vector<8x1xf32>
    %240 = vector.broadcast %239 : vector<8x1xf32> to vector<8x32xf32>
    %241 = arith.subf %231, %240 : vector<8x32xf32>
    %242 = arith.mulf %241, %241 : vector<8x32xf32>
    %cst_98 = arith.constant dense<0.000000e+00> : vector<8xf32>
    %243 = vector.multi_reduction <add>, %242, %cst_98 [1] : vector<8x32xf32> to vector<8xf32>
    %244 = vector.shape_cast %243 : vector<8xf32> to vector<8x1xf32>
    %cst_99 = arith.constant 3.200000e+01 : f32
    %245 = vector.broadcast %cst_99 : f32 to vector<8x1xf32>
    %246 = arith.divf %244, %245 : vector<8x1xf32>
    %247 = vector.broadcast %239 : vector<8x1xf32> to vector<8x32xf32>
    %248 = arith.subf %231, %247 : vector<8x32xf32>
    %cst_100 = arith.constant 9.99999996E-13 : f32
    %249 = vector.broadcast %cst_100 : f32 to vector<8x1xf32>
    %250 = arith.addf %246, %249 : vector<8x1xf32>
    %251 = math.rsqrt %250 : vector<8x1xf32>
    %252 = vector.broadcast %251 : vector<8x1xf32> to vector<8x32xf32>
    %253 = arith.mulf %248, %252 : vector<8x32xf32>
    %254 = vector.broadcast %233 : vector<1x32xf32> to vector<8x32xf32>
    %255 = arith.mulf %253, %254 : vector<8x32xf32>
    %256 = vector.broadcast %235 : vector<1x32xf32> to vector<8x32xf32>
    %257 = arith.addf %255, %256 : vector<8x32xf32>
    %258 = arith.truncf %257 : vector<8x32xf32> to vector<8x32xbf16>
    %c1_101 = arith.constant 1 : index
    %c0_102 = arith.constant 0 : index
    %c0_103 = arith.constant 0 : index
    %259 = vector.load %arg11[%c1_101, %c0_102, %c0_103] : memref<2x32x64xbf16, #tpu.memory_space<vmem>>, vector<1x32x64xbf16>
    %260 = vector.shape_cast %259 : vector<1x32x64xbf16> to vector<32x64xbf16>
    %cst_104 = arith.constant dense<0.000000e+00> : vector<8x64xf32>
    %261 = tpu.matmul %258, %260, %cst_104 {dimension_numbers = #tpu.dot_dimension_numbers<[1], [0], [0], [1], [0, 0, 1, 1], [], []>} : vector<8x32xbf16>, vector<32x64xbf16>, vector<8x64xf32> -> vector<8x64xf32>
    %c1_105 = arith.constant 1 : index
    %c0_106 = arith.constant 0 : index
    %c0_107 = arith.constant 0 : index
    %262 = vector.load %arg12[%c1_105, %c0_106, %c0_107] : memref<2x1x64xf32, #tpu.memory_space<vmem>>, vector<1x1x64xf32>
    %263 = vector.shape_cast %262 : vector<1x1x64xf32> to vector<1x64xf32>
    %264 = vector.broadcast %263 : vector<1x64xf32> to vector<8x64xf32>
    %265 = arith.addf %261, %264 : vector<8x64xf32>
    %cst_108 = arith.constant 5.000000e-01 : f32
    %266 = vector.broadcast %cst_108 : f32 to vector<8x64xf32>
    %267 = arith.mulf %266, %265 : vector<8x64xf32>
    %cst_109 = arith.constant 4.471500e-02 : f32
    %268 = vector.broadcast %cst_109 : f32 to vector<8x64xf32>
    %269 = arith.mulf %268, %265 : vector<8x64xf32>
    %270 = arith.mulf %269, %265 : vector<8x64xf32>
    %271 = arith.mulf %270, %265 : vector<8x64xf32>
    %272 = arith.addf %265, %271 : vector<8x64xf32>
    %cst_110 = arith.constant 0.797884583 : f32
    %273 = vector.broadcast %cst_110 : f32 to vector<8x64xf32>
    %274 = arith.mulf %273, %272 : vector<8x64xf32>
    %275 = math.tanh %274 : vector<8x64xf32>
    %cst_111 = arith.constant 1.000000e+00 : f32
    %276 = vector.broadcast %cst_111 : f32 to vector<8x64xf32>
    %277 = arith.addf %276, %275 : vector<8x64xf32>
    %278 = arith.mulf %267, %277 : vector<8x64xf32>
    %279 = arith.truncf %278 : vector<8x64xf32> to vector<8x64xbf16>
    %c1_112 = arith.constant 1 : index
    %c0_113 = arith.constant 0 : index
    %c0_114 = arith.constant 0 : index
    %280 = vector.load %arg13[%c1_112, %c0_113, %c0_114] : memref<2x64x32xbf16, #tpu.memory_space<vmem>>, vector<1x64x32xbf16>
    %281 = vector.shape_cast %280 : vector<1x64x32xbf16> to vector<64x32xbf16>
    %cst_115 = arith.constant dense<0.000000e+00> : vector<8x32xf32>
    %282 = tpu.matmul %279, %281, %cst_115 {dimension_numbers = #tpu.dot_dimension_numbers<[1], [0], [0], [1], [0, 0, 1, 1], [], []>} : vector<8x64xbf16>, vector<64x32xbf16>, vector<8x32xf32> -> vector<8x32xf32>
    %c1_116 = arith.constant 1 : index
    %c0_117 = arith.constant 0 : index
    %c0_118 = arith.constant 0 : index
    %283 = vector.load %arg14[%c1_116, %c0_117, %c0_118] : memref<2x1x32xf32, #tpu.memory_space<vmem>>, vector<1x1x32xf32>
    %284 = vector.shape_cast %283 : vector<1x1x32xf32> to vector<1x32xf32>
    %285 = vector.broadcast %284 : vector<1x32xf32> to vector<8x32xf32>
    %286 = arith.addf %282, %285 : vector<8x32xf32>
    %287 = arith.addf %257, %286 : vector<8x32xf32>
    %c1_119 = arith.constant 1 : index
    %c0_120 = arith.constant 0 : index
    %c0_121 = arith.constant 0 : index
    %288 = vector.load %arg15[%c1_119, %c0_120, %c0_121] : memref<2x1x32xf32, #tpu.memory_space<vmem>>, vector<1x1x32xf32>
    %289 = vector.shape_cast %288 : vector<1x1x32xf32> to vector<1x32xf32>
    %c1_122 = arith.constant 1 : index
    %c0_123 = arith.constant 0 : index
    %c0_124 = arith.constant 0 : index
    %290 = vector.load %arg16[%c1_122, %c0_123, %c0_124] : memref<2x1x32xf32, #tpu.memory_space<vmem>>, vector<1x1x32xf32>
    %291 = vector.shape_cast %290 : vector<1x1x32xf32> to vector<1x32xf32>
    %cst_125 = arith.constant dense<0.000000e+00> : vector<8xf32>
    %292 = vector.multi_reduction <add>, %287, %cst_125 [1] : vector<8x32xf32> to vector<8xf32>
    %293 = vector.shape_cast %292 : vector<8xf32> to vector<8x1xf32>
    %cst_126 = arith.constant 3.200000e+01 : f32
    %294 = vector.broadcast %cst_126 : f32 to vector<8x1xf32>
    %295 = arith.divf %293, %294 : vector<8x1xf32>
    %296 = vector.broadcast %295 : vector<8x1xf32> to vector<8x32xf32>
    %297 = arith.subf %287, %296 : vector<8x32xf32>
    %298 = arith.mulf %297, %297 : vector<8x32xf32>
    %cst_127 = arith.constant dense<0.000000e+00> : vector<8xf32>
    %299 = vector.multi_reduction <add>, %298, %cst_127 [1] : vector<8x32xf32> to vector<8xf32>
    %300 = vector.shape_cast %299 : vector<8xf32> to vector<8x1xf32>
    %cst_128 = arith.constant 3.200000e+01 : f32
    %301 = vector.broadcast %cst_128 : f32 to vector<8x1xf32>
    %302 = arith.divf %300, %301 : vector<8x1xf32>
    %303 = vector.broadcast %295 : vector<8x1xf32> to vector<8x32xf32>
    %304 = arith.subf %287, %303 : vector<8x32xf32>
    %cst_129 = arith.constant 9.99999996E-13 : f32
    %305 = vector.broadcast %cst_129 : f32 to vector<8x1xf32>
    %306 = arith.addf %302, %305 : vector<8x1xf32>
    %307 = math.rsqrt %306 : vector<8x1xf32>
    %308 = vector.broadcast %307 : vector<8x1xf32> to vector<8x32xf32>
    %309 = arith.mulf %304, %308 : vector<8x32xf32>
    %310 = vector.broadcast %289 : vector<1x32xf32> to vector<8x32xf32>
    %311 = arith.mulf %309, %310 : vector<8x32xf32>
    %312 = vector.broadcast %291 : vector<1x32xf32> to vector<8x32xf32>
    %313 = arith.addf %311, %312 : vector<8x32xf32>
    %314 = vector.extract_strided_slice %313 {offsets = [0, 0], sizes = [1, 32], strides = [1, 1]} : vector<8x32xf32> to vector<1x32xf32>
    %315 = vector.extract_strided_slice %313 {offsets = [1, 0], sizes = [1, 32], strides = [1, 1]} : vector<8x32xf32> to vector<1x32xf32>
    %316 = vector.extract_strided_slice %313 {offsets = [2, 0], sizes = [1, 32], strides = [1, 1]} : vector<8x32xf32> to vector<1x32xf32>
    %317 = vector.extract_strided_slice %313 {offsets = [3, 0], sizes = [1, 32], strides = [1, 1]} : vector<8x32xf32> to vector<1x32xf32>
    %318 = tpu.concatenate %314, %315, %316, %317 in 1 : vector<1x32xf32>, vector<1x32xf32>, vector<1x32xf32>, vector<1x32xf32> -> vector<1x128xf32>
    %319 = vector.extract_strided_slice %313 {offsets = [4, 0], sizes = [1, 32], strides = [1, 1]} : vector<8x32xf32> to vector<1x32xf32>
    %320 = vector.extract_strided_slice %313 {offsets = [5, 0], sizes = [1, 32], strides = [1, 1]} : vector<8x32xf32> to vector<1x32xf32>
    %321 = vector.extract_strided_slice %313 {offsets = [6, 0], sizes = [1, 32], strides = [1, 1]} : vector<8x32xf32> to vector<1x32xf32>
    %322 = vector.extract_strided_slice %313 {offsets = [7, 0], sizes = [1, 32], strides = [1, 1]} : vector<8x32xf32> to vector<1x32xf32>
    %323 = tpu.concatenate %319, %320, %321, %322 in 1 : vector<1x32xf32>, vector<1x32xf32>, vector<1x32xf32>, vector<1x32xf32> -> vector<1x128xf32>
    %324 = tpu.concatenate %318, %323 in 0 : vector<1x128xf32>, vector<1x128xf32> -> vector<2x128xf32>
    %c0_130 = arith.constant 0 : index
    %c0_131 = arith.constant 0 : index
    %c0_132 = arith.constant 0 : index
    %325 = vector.load %arg17[%c0_130, %c0_131, %c0_132] : memref<1x2x128xf32, #tpu.memory_space<vmem>>, vector<1x2x128xf32>
    %326 = vector.shape_cast %325 : vector<1x2x128xf32> to vector<2x128xf32>
    %327 = vector.shape_cast %324 : vector<2x128xf32> to vector<1x2x128xf32>
    tpu.vector_store %arg17[%c0_130, %c0_131, %c0_132], %327 {strides = array<i32>} : memref<1x2x128xf32, #tpu.memory_space<vmem>>, vector<1x2x128xf32>,
    return
  }
  func.func @transform_0(%arg0: i32) -> (i32, i32, i32) {
    %c0_i32 = arith.constant 0 : i32
    %c0_i32_0 = arith.constant 0 : i32
    %c0_i32_1 = arith.constant 0 : i32
    return %arg0, %c0_i32, %c0_i32_0 : i32, i32, i32
  }
  func.func @transform_1(%arg0: i32) -> (i32, i32, i32) {
    %c0_i32 = arith.constant 0 : i32
    %c0_i32_0 = arith.constant 0 : i32
    %c0_i32_1 = arith.constant 0 : i32
    return %arg0, %c0_i32, %c0_i32_0 : i32, i32, i32
  }
  func.func @transform_2(%arg0: i32) -> (i32, i32) {
    %c0_i32 = arith.constant 0 : i32
    %c0_i32_0 = arith.constant 0 : i32
    %c0_i32_1 = arith.constant 0 : i32
    return %c0_i32, %c0_i32_0 : i32, i32
  }
  func.func @transform_3(%arg0: i32) -> (i32, i32) {
    %c0_i32 = arith.constant 0 : i32
    %c0_i32_0 = arith.constant 0 : i32
    %c0_i32_1 = arith.constant 0 : i32
    return %c0_i32, %c0_i32_0 : i32, i32
  }
  func.func @transform_4(%arg0: i32) -> (i32, i32, i32) {
    %c0_i32 = arith.constant 0 : i32
    %c0_i32_0 = arith.constant 0 : i32
    %c0_i32_1 = arith.constant 0 : i32
    %c0_i32_2 = arith.constant 0 : i32
    return %c0_i32, %c0_i32_0, %c0_i32_1 : i32, i32, i32
  }
  func.func @transform_5(%arg0: i32) -> (i32, i32, i32) {
    %c0_i32 = arith.constant 0 : i32
    %c0_i32_0 = arith.constant 0 : i32
    %c0_i32_1 = arith.constant 0 : i32
    %c0_i32_2 = arith.constant 0 : i32
    return %c0_i32, %c0_i32_0, %c0_i32_1 : i32, i32, i32
  }
  func.func @transform_6(%arg0: i32) -> (i32, i32, i32) {
    %c0_i32 = arith.constant 0 : i32
    %c0_i32_0 = arith.constant 0 : i32
    %c0_i32_1 = arith.constant 0 : i32
    %c0_i32_2 = arith.constant 0 : i32
    return %c0_i32, %c0_i32_0, %c0_i32_1 : i32, i32, i32
  }
  func.func @transform_7(%arg0: i32) -> (i32, i32, i32) {
    %c0_i32 = arith.constant 0 : i32
    %c0_i32_0 = arith.constant 0 : i32
    %c0_i32_1 = arith.constant 0 : i32
    %c0_i32_2 = arith.constant 0 : i32
    return %c0_i32, %c0_i32_0, %c0_i32_1 : i32, i32, i32
  }
  func.func @transform_8(%arg0: i32) -> (i32, i32, i32) {
    %c0_i32 = arith.constant 0 : i32
    %c0_i32_0 = arith.constant 0 : i32
    %c0_i32_1 = arith.constant 0 : i32
    %c0_i32_2 = arith.constant 0 : i32
    return %c0_i32, %c0_i32_0, %c0_i32_1 : i32, i32, i32
  }
  func.func @transform_9(%arg0: i32) -> (i32, i32, i32) {
    %c0_i32 = arith.constant 0 : i32
    %c0_i32_0 = arith.constant 0 : i32
    %c0_i32_1 = arith.constant 0 : i32
    %c0_i32_2 = arith.constant 0 : i32
    return %c0_i32, %c0_i32_0, %c0_i32_1 : i32, i32, i32
  }
  func.func @transform_10(%arg0: i32) -> (i32, i32, i32) {
    %c0_i32 = arith.constant 0 : i32
    %c0_i32_0 = arith.constant 0 : i32
    %c0_i32_1 = arith.constant 0 : i32
    %c0_i32_2 = arith.constant 0 : i32
    return %c0_i32, %c0_i32_0, %c0_i32_1 : i32, i32, i32
  }
  func.func @transform_11(%arg0: i32) -> (i32, i32, i32) {
    %c0_i32 = arith.constant 0 : i32
    %c0_i32_0 = arith.constant 0 : i32
    %c0_i32_1 = arith.constant 0 : i32
    %c0_i32_2 = arith.constant 0 : i32
    return %c0_i32, %c0_i32_0, %c0_i32_1 : i32, i32, i32
  }
  func.func @transform_12(%arg0: i32) -> (i32, i32, i32) {
    %c0_i32 = arith.constant 0 : i32
    %c0_i32_0 = arith.constant 0 : i32
    %c0_i32_1 = arith.constant 0 : i32
    %c0_i32_2 = arith.constant 0 : i32
    return %c0_i32, %c0_i32_0, %c0_i32_1 : i32, i32, i32
  }
  func.func @transform_13(%arg0: i32) -> (i32, i32, i32) {
    %c0_i32 = arith.constant 0 : i32
    %c0_i32_0 = arith.constant 0 : i32
    %c0_i32_1 = arith.constant 0 : i32
    %c0_i32_2 = arith.constant 0 : i32
    return %c0_i32, %c0_i32_0, %c0_i32_1 : i32, i32, i32
  }
  func.func @transform_14(%arg0: i32) -> (i32, i32, i32) {
    %c0_i32 = arith.constant 0 : i32
    %c0_i32_0 = arith.constant 0 : i32
    %c0_i32_1 = arith.constant 0 : i32
    %c0_i32_2 = arith.constant 0 : i32
    return %c0_i32, %c0_i32_0, %c0_i32_1 : i32, i32, i32
  }
  func.func @transform_15(%arg0: i32) -> (i32, i32, i32) {
    %c0_i32 = arith.constant 0 : i32
    %c0_i32_0 = arith.constant 0 : i32
    %c0_i32_1 = arith.constant 0 : i32
    %c0_i32_2 = arith.constant 0 : i32
    return %c0_i32, %c0_i32_0, %c0_i32_1 : i32, i32, i32
  }
  func.func @transform_16(%arg0: i32) -> (i32, i32, i32) {
    %c0_i32 = arith.constant 0 : i32
    %c0_i32_0 = arith.constant 0 : i32
    %c0_i32_1 = arith.constant 0 : i32
    return %arg0, %c0_i32, %c0_i32_0 : i32, i32, i32
  }
}

</mosaic_0001>

<bundles_post_ra>
// kernel: tpu_custom_call.1
= control target key start
LH: loop header
LB: loop body
LE: loop exit
PB: predicated region body
PF: predicated region fallthrough
CT: control target
= control target key end

     0   :  { %s2582_s0 = inlined_call_operand.hbm [shape: f32[2,8,32], index: 0, kind: input, shape index: {}]   ;;  %s2583_s1 = inlined_call_operand.hbm [shape: f32[2,1,8], index: 1, kind: input, shape index: {}]   ;;  %s2584_s2 = inlined_call_operand.vmem [shape: f32[1,32], index: 2, kind: input, shape index: {}]   ;;  %s2585_s3 = inlined_call_operand.hbm [shape: f32[1,32], index: 3, kind: input, shape index: {}]   ;;  %s2586_s4 = inlined_call_operand.vmem [shape: bf16[2,32,96], index: 4, kind: input, shape index: {}]   ;;  %s2587_s5 = inlined_call_operand.vmem [shape: f32[2,1,96], index: 5, kind: input, shape index: {}]   ;;  %s2588_s6 = inlined_call_operand.vmem [shape: bf16[2,32,32], index: 6, kind: input, shape index: {}]   ;;  %s2589_s7 = inlined_call_operand.vmem [shape: f32[2,1,32], index: 7, kind: input, shape index: {}]   ;;  %s2590_s8 = inlined_call_operand.vmem [shape: f32[2,1,32], index: 8, kind: input, shape index: {}]   ;;  %s2591_s9 = inlined_call_operand.hbm [shape: f32[2,1,32], index: 9, kind: input, shape index: {}]   ;;  %s2592_s10 = inlined_call_operand.vmem [shape: bf16[2,32,64], index: 10, kind: input, shape index: {}]   ;;  %s2593_s11 = inlined_call_operand.vmem [shape: f32[2,1,64], index: 11, kind: input, shape index: {}]   ;;  %s2594_s12 = inlined_call_operand.vmem [shape: bf16[2,64,32], index: 12, kind: input, shape index: {}]   ;;  %s2595_s13 = inlined_call_operand.vmem [shape: f32[2,1,32], index: 13, kind: input, shape index: {}]   ;;  %s2596_s14 = inlined_call_operand.vmem [shape: f32[2,1,32], index: 14, kind: input, shape index: {}]   ;;  %s2597_s15 = inlined_call_operand.hbm [shape: f32[2,1,32], index: 15, kind: input, shape index: {}]   ;;  %s2598_s16 = inlined_call_operand.hbm [shape: f32[2,2,128], index: 16, kind: output, shape index: {}]  }
   0x1   :  { %2613 = sst [smem:[#allocation24_spill]] %s2582_s0 }
   0x2   :  { %2614 = sst [smem:[#allocation25_spill]] %s2585_s3 }
   0x3   :  { %2615 = sst [smem:[#allocation26_spill]] %s2591_s9 }
   0x4   :  { %2616 = sst [smem:[#allocation27_spill]] %s2593_s11 }
   0x5   :  { %2617 = sst [smem:[#allocation28_spill]] %s2594_s12 }
   0x6   :  { %2618 = sst [smem:[#allocation29_spill]] %s2595_s13 }
   0x7   :  { %2619 = sst [smem:[#allocation30_spill]] %s2596_s14 }
   0x8   :  { %2620 = sst [smem:[#allocation31_spill]] %s2597_s15 }
   0x9   :  { %2621 = sst [smem:[#allocation32_spill]] %s2598_s16 }
   0xa   :  { %21 = vsyncpa [#allocation3], 0 }
   0xb   :  { %23 = vsyncpa [#allocation3 + $0x1], 0 }
   0xc   :  { %24 = vsyncpa [#allocation6], 0 }
   0xd   :  { %26 = vsyncpa [#allocation6 + $0x1], 0 }
   0xe   :  { %27 = vsyncpa [#allocation9], 0 }
   0xf   :  { %28 = vsyncpa [#allocation4], 0 }
  0x10   :  { %30 = vsyncpa [#allocation4 + $0x1], 0  ;;  %s2202_s21 = smov 0   ;;  %s2204_s22 = smov 0  }
  0x11   :  { %s2206_s23 = smov 0   ;;  %s2208_s24 = smov 0  }
  0x12 LB: > { %2622 = sst [smem:[#allocation17_spill]] %s2092_s21  ;;  %s2223_s25 = sadd.s32 4294967295, %s2104_s24   ;;  %s2104_s24 = sphi %s2208_s24, %s2650_s24   ;;  %s2100_s23 = sphi %s2206_s23, %s2652_s23   ;;  %s2096_s22 = sphi %s2204_s22, %s2654_s22   ;;  %s2092_s21 = sphi %s2202_s21, %s2653_s21  }
  0x13   : > { %2623 = sst [smem:[#allocation18_spill]] %s2100_s23  ;;  %s1575_s26 = sadd.s32 4294967294, %s2104_s24  }
  0x14   : > { %2624 = sst [smem:[#allocation19_spill]] %s2104_s24  ;;  %p56_p0 = scmp.ne.s32.totalorder %s2096_s22, %s2092_s21 }
  0x15   : > { %p57_p1 = scmp.eq.s32.totalorder %s2223_s25, 0  ;;  %p400_p2 = scmp.eq.s32.totalorder %s2223_s25, 1 }
  0x16   : > { %p406_p3 = scmp.eq.s32.totalorder %s1575_s26, 1  ;;  %p1576_p5 = scmp.ge.s32.totalorder %s2104_s24, 1 }
  0x17   : > { %p2232_p4 = por %p57_p1, %p56_p0  ;;  %p413_p7 = scmp.lt.s32.totalorder %s2104_s24, 3 }
  0x18   : > { %p2237_p6 = por %p406_p3, %p56_p0  ;;  %s2628_s3 = sld [smem:[#allocation25_spill]] }
  0x19   : > { %p2245_p8 = pnand %p1576_p5, %p413_p7  ;;  %s2106_s18 = smov [#allocation7]  }
  0x1a   : > { %s2626_s28 = scalar_select %p2237_p6, 1, 0 }
  0x1b   : > { %p1753_p10 = pneg %p2245_p8  ;;  %s430_s19 = sshll.u32 %s2106_s18, 4  ;;  %s431_s19 = int_to_ptr.vmem [resolvable:$true] %s430_s19 }
  0x1c   : > { %2627 = sst [smem:[#allocation20_spill]] %s2626_s28  ;;  %s2107_s30 = smov [#allocation8]  }
  0x1d   : > { %s2630_s9 = sld [smem:[#allocation26_spill]]  ;;  %p2257_p11 = pnand %p1753_p10, %p57_p1 }
  0x1e   : > { %s428_s0 = sshll.u32 %s2628_s3, 4  ;;  %s456_s3 = sshll.u32 %s2107_s30, 4  ;;  %s429_s0 = int_to_ptr.hbm [resolvable:$true] %s428_s0  ;;  %s457_s3 = int_to_ptr.vmem [resolvable:$true] %s456_s3 }
  0x1f   : > { %1756 = dma.hbm_to_vmem [thread:$0]  (!%p2257_p11), %s429_s0, 16, %s431_s19, [#allocation6]  }
  0x20   : > { %s2108_s18 = smov 16   ;;  %s2109_s20 = smov 1  }
  0x21   : > { %s2632_s15 = sld [smem:[#allocation31_spill]]  ;;  %s2110_s30 = smov [#allocation10]  }
  0x22   : > { %s485_s16 = sshll.u32 %s2110_s30, 4  ;;  %s2271_s0 = sadd.s32 1, %s2104_s24   ;;  %s486_s16 = int_to_ptr.vmem [resolvable:$true] %s485_s16 }
  0x23   : > { %s454_s28 = sshll.u32 %s2630_s9, 4  ;;  %2633 = sst [smem:[#allocation21_spill]] %s2271_s0  ;;  %s455_s28 = int_to_ptr.hbm [resolvable:$true] %s454_s28 }
  0x24   : > { %1759 = dma.hbm_to_vmem [thread:$0]  (!%p2257_p11), %s455_s28, 32, %s457_s3, [#allocation9], %s2108_s18, %s2108_s18, %s2109_s20  }
  0x25   : > { %s40_s19 = ssub.s32 %s2104_s24, %s2271_s0  ;;  %s43_s14 = sadd.s32 1, %s2100_s23 }
  0x26   : > { %p41_p12 = scmp.eq.s32.totalorder %s40_s19, 0  ;;  %p50_p13 = scmp.ne.s32.totalorder %s2100_s23, %s2096_s22 }
  0x27   : > { %s483_s21 = sshll.u32 %s2632_s15, 4  ;;  %p51_p0 = scmp.eq.s32.totalorder %s2104_s24, 0  ;;  %s484_s21 = int_to_ptr.hbm [resolvable:$true] %s483_s21 }
  0x28   : > { %1762 = dma.hbm_to_vmem [thread:$0]  (!%p2257_p11), %s484_s21, 32, %s486_s16, [#allocation9], %s2108_s18, %s2108_s18, %s2109_s20  }
  0x29   : > { %p1777_p3 = scmp.lt.s32.totalorder %s2104_s24, 2  ;;  %p52_p5 = por %p51_p0, %p50_p13 }
  0x2a   : > { %s2281_s3 = scalar_select %p41_p12, %s2100_s23, %s43_s14  }
  0x2b   : > { %p2285_p7 = por %p400_p2, %p50_p13  ;;  %s2290_s16 = sand.u32 1, %s2100_s23  }
  0x2c   : > { %2634 = sst [smem:[#allocation22_spill]] %s2281_s3  ;;  %s1582_s21 = sshll.u32 %s2104_s24, 3 }
  0x2d   : > { %s2635_s9 = scalar_select %p2285_p7, 1, 0 }
  0x2e   : > { %s1581_s28 = sshll.u32 %s2290_s16, 3  ;;  %s2637_s20 = sld [smem:[#allocation24_spill]] }
  0x2f   : > { %2636 = sst [smem:[#allocation23_spill]] %s2635_s9  ;;  %s503_s19 = scalar_lea.vmem [#allocation2], %s1581_s28 }
  0x30   : > { %s511_s14 = sshll.u32 %s503_s19, 4  ;;  %p2299_p2 = pnand %p1777_p3, %p52_p5  ;;  %s512_s14 = int_to_ptr.vmem [resolvable:$true] %s511_s14 }
  0x31   : > { %s518_s3 = sand.u32 1, %s2104_s24   ;;  %s524_s9 = scalar_lea.hbm %s2583_s1, %s2104_s24 }
  0x32   : > { %s500_s13 = scalar_lea.sflag [#allocation3], %s2290_s16  ;;  %p1970_p11 = pneg %p2299_p2 }
  0x34   : > { %s507_s26 = scalar_lea.hbm %s2637_s20, %s1582_s21 }
  0x35   : > { %s509_s30 = sshll.u32 %s507_s26, 4  ;;  %s1973_s26 = scalar_lea.hbm %s2637_s20, 16  ;;  %s510_s30 = int_to_ptr.hbm [resolvable:$true] %s509_s30 }
  0x36   : > { %s1966_s29 = sshra.s32 %s510_s30, 4  ;;  %s1967_s29 = int_to_ptr.hbm [resolvable:$true] %s1966_s29 }
  0x37   : > { %s1968_s21 = scalar_lea.hbm %s1967_s29, 8  ;;  %p1974_p0 = scmp.lt.s32.totalorder %s1967_s29, %s2637_s20 }
  0x38   : > { %p1969_p10 = scmp.ne.s32.totalorder %s1967_s29, %s1968_s21  ;;  %p1975_p3 = scmp.lt.s32.totalorder %s1973_s26, %s1968_s21 }
  0x3a   : > { %p1971_p12 = pnand %p1970_p11, %p1969_p10  ;;  %p1976_p5 = por %p1975_p3, %p1974_p0 }
  0x3c   : > { %p1972_p13 = pneg %p1971_p12 }
  0x3e   : > { %p1977_p9 = pnand %p1976_p5, %p1972_p13 }
  0x40   : > { %1980 = shalt.err (!%p1977_p9)
}
  0x41   : > { %1766 = dma.hbm_to_vmem [thread:$0]  (!%p2299_p2), %s510_s30, 128, %s512_s14, %s500_s13  }
  0x42   : > { %s526_s23 = sshll.u32 %s524_s9, 4  ;;  %s521_s0 = scalar_lea.vmem [#allocation5], %s2290_s16  ;;  %s527_s23 = int_to_ptr.hbm [resolvable:$true] %s526_s23 }
  0x43   : > { %s528_s24 = sshll.u32 %s521_s0, 4  ;;  %s519_s28 = scalar_lea.sflag [#allocation6], %s518_s3  ;;  %s529_s24 = int_to_ptr.vmem [resolvable:$true] %s528_s24 }
  0x44   : > { %s1996_s18 = sshra.s32 %s527_s23, 4  ;;  %s2003_s21 = scalar_lea.hbm %s2583_s1, 2  ;;  %s1997_s18 = int_to_ptr.hbm [resolvable:$true] %s1996_s18 }
  0x45   : > { %s1998_s12 = scalar_lea.hbm %s1997_s18, 1  ;;  %p2004_p9 = scmp.lt.s32.totalorder %s1997_s18, %s2583_s1 }
  0x46   : > { %p1999_p10 = scmp.ne.s32.totalorder %s1997_s18, %s1998_s12  ;;  %p2005_p0 = scmp.lt.s32.totalorder %s2003_s21, %s1998_s12 }
  0x48   : > { %p2001_p12 = pnand %p1999_p10, %p1970_p11  ;;  %p2006_p3 = por %p2005_p0, %p2004_p9 }
  0x4a   : > { %p2002_p13 = pneg %p2001_p12 }
  0x4c   : > { %p2007_p5 = pnand %p2006_p3, %p2002_p13 }
  0x4e   : > { %2010 = shalt.err (!%p2007_p5)
}
  0x4f   : > { %1769 = dma.hbm_to_vmem [thread:$0]  (!%p2299_p2), %s527_s23, 16, %s529_s24, %s519_s28  }
  0x50   : > { %537 = sbr.rel (%p2245_p8) target bundleno = 4388 (0x1124), region = 84  ;;  %s2337_s3 = sand.u32 (!%p2245_p8), 1, %s2096_s22  }
  0x51   : > { %s1584_s9 = sshll.u32 (!%p2245_p8), %s2337_s3, 3  ;;  %s540_s16 = scalar_lea.sflag (!%p2245_p8), [#allocation3], %s2337_s3 }
  0x52   : > { %s543_s30 = scalar_lea.vmem (!%p2245_p8), [#allocation2], %s1584_s9 }
  0x55   : > { %2071 = dma.done.wait (%p2232_p4), %s540_s16, 128  }
  0x56   : > { %2073 = vsyncadd (%p2232_p4), %s540_s16, 4294967168  ;;  %s549_s12 = sand.u32 1, %s2223_s25   ;;  %s552_s24 = scalar_lea.vmem [#allocation5], %s2337_s3 }
  0x57   : > { %s550_s15 = scalar_lea.sflag [#allocation6], %s549_s12 }
  0x58   : > { %2075 = dma.done.wait (%p2232_p4), %s550_s15, 16  }
  0x59   : > { %2077 = vsyncadd (%p2232_p4), %s550_s15, 4294967280 }
  0x5a   : > { %2079 = dma.done.wait (%p57_p1), [#allocation6], 16  }
  0x5b   : > { %2081 = vsyncadd (%p57_p1), [#allocation6], 4294967280 }
  0x5c   : > { %2083 = dma.done.wait (%p57_p1), [#allocation9], 64  }
  0x5d   : > { %2085 = vsyncadd (%p57_p1), [#allocation9], 4294967232  ;;  %vm626_vm0 = vcmask 261120   ;;  %v623_v0 = vld [vmem:[%s543_s30] sm:$0xff]  ;;  %v2111_v2 = vmov 32.0   ;;  %s2112_s11 = smov 112  }
  0x5e   : > { %v627_v1 = vsel %vm626_vm0, %v623_v0, 0.0  ;;  %1844 = vrcp.f32 %v2111_v2  ;;  %v1716_v14 = vld [vmem:[%s2586_s4 + $0x8] sm:$0xff]  ;;  %v1715_v15 = vld [vmem:[%s2586_s4] sm:$0xff]  ;;  %v1826_v28 = vld [vmem:[#allocation7] ss:$0 sm:$0xff]  ;;  %s2113_s29 = smov 96  }
  0x5f   : > { %628 = vadd.xlane.f32.xlu0 %v627_v1  ;;  %694 = vmatpush.bf16.msra.mxu0 %v1716_v14  ;;  %v1825_v25 = vld [vmem:[%s2584_s2] ss:$0 sm:$0xff]  ;;  %vm712_vm5 = vcmask 130048   ;;  %vm763_vm6 = vcmask 64512   ;;  %s2114_s21 = smov 64   ;;  %vm793_vm7 = vcmask 1043456  }
  0x60   : > { %v1827_v32 = vld [vmem:[%s2587_s5] ss:$0 sm:$0xff]  ;;  %s2115_s9 = smov 16   ;;  %s2639_s18 = sld [smem:[#allocation28_spill]]  ;;  %vm989_vm11 = vcmask 523264  }
  0x61   : > { %v2391_v47 = vld [vmem:[%s552_s24] ss:$0 sm:$0xff]  ;;  %s2640_s17 = sld [smem:[#allocation27_spill]]  ;;  %s1588_s14 = sshll.u32 %s2337_s3, 1 }
  0x62   : > { %s2641_s23 = sld [smem:[#allocation29_spill]]  ;;  %s1712_s19 = sshll.u32 %s2223_s25, 1 }
  0x63   : > { %695 = vmatpush.bf16.msra.mxu0 %v1715_v15  ;;  %s2643_s15 = sld [smem:[#allocation30_spill]]  ;;  %s620_s13 = scalar_lea.vmem [#allocation11], %s1588_s14 }
  0x64   : > { %v1845_v3 = vpop.eup %1844  ;;  %s2644_s26 = sld [smem:[#allocation32_spill]]  ;;  %s1455_s16 = sshll.u32 %s620_s13, 4  ;;  %s1456_s16 = int_to_ptr.vmem [resolvable:$true] %s1455_s16 }
  0x65   : > { %v631_v4 = vmul.f32 32.0, %v1845_v3  ;;  %vm635_vm1 = vweird.f32 %v1845_v3  ;;  %s1443_s25 = scalar_lea.sflag [#allocation4], %s2337_s3 }
  0x67   : > { %v632_v5 = vsub.f32 1.0, %v631_v4 }
  0x68   : > { %s2642_s0 = smov %s2641_s23 }
  0x69   : > { %v633_v6 = vmul.f32 %v1845_v3, %v632_v5 }
  0x6b   : > { %v634_v7 = vadd.f32 %v1845_v3, %v633_v6 }
  0x6d   : > { %v2360_v8 = vsel %vm635_vm1, %v1845_v3, %v634_v7 }
  0xd2   : > { %v629_v9 = vpop.xlane.xlu0 %628 }
  0xd3   : > { %v637_v10 = vmul.f32 %v2360_v8, %v629_v9 }
  0xd5   : > { %v638_v11 = vsub.f32 %v623_v0, %v637_v10 }
  0xd7   : > { %v639_v12 = vmul.f32 %v638_v11, %v638_v11 }
  0xd9   : > { %v640_v13 = vsel %vm626_vm0, %v639_v12, 0.0 }
  0xda   : > { %641 = vadd.xlane.f32.xlu0 %v640_v13 }
 0x14d   : > { %v642_v16 = vpop.xlane.xlu0 %641 }
 0x14e   : > { %v643_v17 = vmul.f32 %v642_v16, %v2360_v8 }
 0x150   : > { %v644_v18 = vadd.f32 1e-12, %v643_v17 }
 0x152   : > { %1846 = vrsqrt.f32 %v644_v18  ;;  %vm651_vm3 = vweird.f32 %v644_v18 }
 0x158   : > { %v1847_v19 = vpop.eup %1846 }
 0x159   : > { %v646_v20 = vmul.f32 %v1847_v19, %v644_v18  ;;  %vm652_vm2 = vweird.f32 %v1847_v19 }
 0x15a   : > { %vm653_vm4 = vmor %vm651_vm3, %vm652_vm2 }
 0x15b   : > { %v647_v21 = vmul.f32 %v1847_v19, %v646_v20 }
 0x15d   : > { %v648_v22 = vmul.f32 0.5, %v647_v21 }
 0x15f   : > { %v649_v23 = vsub.f32 1.5, %v648_v22  ;;  %v1717_v22 = vld [vmem:[%s2588_s6] sm:$0xff] }
 0x161   : > { %v650_v24 = vmul.f32 %v1847_v19, %v649_v23 }
 0x163   : > { %v654_v26 = vsel %vm653_vm4, %v1847_v19, %v650_v24  ;;  %v1718_v19 = vld [vmem:[%s2588_s6 + $0x8] sm:$0xff] }
 0x164   : > { %v655_v27 = vmul.f32 %v654_v26, %v638_v11  ;;  %866 = vmatpush.bf16.msrb.mxu0 %v1718_v19  ;;  %v1829_v26 = vld [vmem:[%s2589_s7] ss:$0 sm:$0xff] }
 0x166   : > { %v659_v29 = vmul.f32 %v1825_v25, %v655_v27 }
 0x168   : > { %v2374_v30 = vadd.f32 %v1826_v28, %v659_v29  ;;  %867 = vmatpush.bf16.msrb.mxu0 %v1717_v22  ;;  %v1726_v22 = vld [vmem:[%s2586_s4 + $0x18] sm:$0xff] }
 0x16a   : > { %v664_v31 = vpack.c.bf16 %v2374_v30, %v2374_v30 }
 0x16c   : > { %1597 = vmatmul.msk.bf16.vlgmr.msra.gmra.mxu0 %vm626_vm0, %v664_v31 }
 0x1e9   : > { %v697_v33 = vpop.f32.mrf.mxu0 }
 0x1ea   : > { %v698_v34 = vadd.f32 %v1827_v32, %v697_v33 }
 0x1ec   : > { %v705_v35 = vpack.c.bf16 %v698_v34, %v698_v34  ;;  %702 = vrot.lane.b32.xlu1 %v698_v34, %s2112_s11 }
 0x1ee   : > { %v708_v36 = vunpack.c.l.b16 %v705_v35 }
 0x1f0   : > { %v709_v38 = vpack.c.b16 %v708_v36, %v708_v36 }
 0x1f1   : > { %v699_v37 = vpop.f32.mrf.mxu0 }
 0x1f4   : > { %710 = vrot.lane.b32.xlu1 %v709_v38, %s2113_s29 }
 0x25e   : > { %v703_v39 = vpop.permute.xlu1 %702 }
 0x25f   : > { %v706_v40 = vpack.c.bf16 %v703_v39, %v703_v39 }
 0x261   : > { %v733_v41 = vunpack.c.l.b16 %v706_v40 }
 0x263   : > { %v734_v42 = vpack.c.b16 %v733_v41, %v733_v41 }
 0x265   : > { %735 = vrot.lane.b32.xlu2 %v734_v42, %s2113_s29 }
 0x266   : > { %v711_v43 = vpop.permute.xlu1 %710 }
 0x267   : > { %v717_v44 = vsel %vm712_vm5, %v711_v43, 0 }
 0x268   : > { %726 = vmatpush.bf16.xpose.msra.mxu1 %v717_v44 }
 0x26f   : > { %1598 = vmatmul.msk.bf16.vlgmr.msra.gmra.mxu1 %vm712_vm5, %v705_v35 }
 0x2bf   : > { %v736_v45 = vpop.permute.xlu2 %735 }
 0x2c0   : > { %v741_v46 = vsel %vm712_vm5, %v736_v45, 0 }
 0x2c1   : > { %750 = vmatpush.bf16.xpose.msra.mxu2 %v741_v46 }
 0x2c8   : > { %1599 = vmatmul.msk.bf16.vlgmr.msra.gmra.mxu2 %vm712_vm5, %v706_v40 }
 0x2ec   : > { %v728_v48 = vpop.f32.mrf.mxu1 }
 0x2ed   : > { %v756_v49 = vmul.f32 0.25, %v728_v48 }
 0x2ef   : > { %v761_v50 = vadd.f32 %v2391_v47, %v756_v49  ;;  %v1830_v49 = vld [vmem:[%s2590_s8] ss:$0 sm:$0xff] }
 0x2f1   : > { %v764_v51 = vsel %vm763_vm6, %v761_v50, -inf }
 0x2f2   : > { %765 = vmax.xlane.f32.xlu2 %v764_v51 }
 0x2f4   : > { %v730_v52 = vpop.f32.mrf.mxu1 }
 0x2f5   : > { %v1831_v52 = vld [vmem:[#allocation8] ss:$0 sm:$0xff] }
 0x30a   : > { %810 = vrot.lane.b32.xlu2 %v734_v42, %s2114_s21 }
 0x34b   : > { %v752_v53 = vpop.f32.mrf.mxu2 }
 0x34c   : > { %v757_v54 = vmul.f32 0.25, %v752_v53 }
 0x34e   : > { %v762_v55 = vadd.f32 %v2391_v47, %v757_v54 }
 0x350   : > { %v767_v56 = vsel %vm763_vm6, %v762_v55, -inf }
 0x351   : > { %768 = vmax.xlane.f32.xlu0 %v767_v56  ;;  %v1724_v56 = vld [vmem:[%s2639_s18 + $0x18] sm:$0xff] }
 0x352   : > { %997 = vmatpush.bf16.msrb.mxu2 %v1724_v56 }
 0x353   : > { %v754_v57 = vpop.f32.mrf.mxu2 }
 0x354   : > { %v1723_v57 = vld [vmem:[%s2639_s18 + $0x10] sm:$0xff] }
 0x356   : > { %998 = vmatpush.bf16.msrb.mxu2 %v1723_v57 }
 0x365   : > { %788 = vrot.lane.b32.xlu0 %v709_v38, %s2114_s21  ;;  %v766_v58 = vpop.xlane.xlu2 %765  ;;  %v1720_v38 = vld [vmem:[%s2592_s10 + $0x8] sm:$0xff] }
 0x366   : > { %v770_v59 = vsub.f32 %v761_v50, %v766_v58  ;;  %936 = vmatpush.bf16.msrb.mxu1 %v1720_v38  ;;  %v1722_v58 = vld [vmem:[%s2639_s18 + $0x8] sm:$0xff] }
 0x367   : > { %999 = vmatpush.bf16.msrb.mxu2 %v1722_v58 }
 0x368   : > { %v772_v60 = vmul.f32 1.442695, %v770_v59  ;;  %v1721_v59 = vld [vmem:[%s2639_s18] sm:$0xff] }
 0x36a   : > { %1848 = vpow2.f32 %v772_v60  ;;  %v1832_v60 = vld [vmem:[%s2640_s17] ss:$0 sm:$0xff] }
 0x36b   : > { %1000 = vmatpush.bf16.msrb.mxu2 %v1721_v59 }
 0x36d   : > { %v811_v4 = vpop.permute.xlu2 %810 }
 0x36e   : > { %v816_v7 = vsel %vm793_vm7, %v811_v4, 0 }
 0x370   : > { %v1849_v61 = vpop.eup %1848 }
 0x371   : > { %v776_v62 = vsel %vm763_vm6, %v1849_v61, 0.0 }
 0x372   : > { %777 = vadd.xlane.f32.xlu1 %v776_v62 }
 0x3c4   : > { %v769_v63 = vpop.xlane.xlu0 %768 }
 0x3c5   : > { %v771_v0 = vsub.f32 %v762_v55, %v769_v63 }
 0x3c7   : > { %v774_v1 = vmul.f32 1.442695, %v771_v0 }
 0x3c9   : > { %1850 = vpow2.f32 %v774_v1 }
 0x3cf   : > { %v1851_v2 = vpop.eup %1850 }
 0x3d0   : > { %v779_v3 = vsel %vm763_vm6, %v1851_v2, 0.0 }
 0x3d1   : > { %780 = vadd.xlane.f32.xlu0 %v779_v3 }
 0x3d7   : > { %v789_v5 = vpop.permute.xlu0 %788 }
 0x3d8   : > { %v795_v6 = vsel %vm793_vm7, %v789_v5, 0 }
 0x3d9   : > { %804 = vmatpush.bf16.msra.mxu3 %v795_v6 }
 0x3dd   : > { %825 = vmatpush.bf16.msrb.mxu3 %v816_v7 }
 0x3e5   : > { %v778_v9 = vpop.xlane.xlu1 %777 }
 0x3e6   : > { %1852 = vrcp.f32 %v778_v9 }
 0x3ec   : > { %v1853_v10 = vpop.eup %1852 }
 0x3ed   : > { %v784_v11 = vmul.f32 %v1853_v10, %v1849_v61 }
 0x3ef   : > { %v786_v12 = vpack.c.bf16 %v784_v11, %v784_v11  ;;  %v1833_v11 = vld [vmem:[%s2641_s23] ss:$0 sm:$0xff] }
 0x3f1   : > { %1600 = vmatmul.msk.bf16.vlgmr.msra.gmra.mxu3 %vm763_vm6, %v786_v12 }
 0x3f2   : > { %1071 = vmatpush.bf16.msra.mxu3 %v1726_v22 }
 0x444   : > { %v781_v13 = vpop.xlane.xlu0 %780 }
 0x445   : > { %1854 = vrcp.f32 %v781_v13 }
 0x44b   : > { %v1855_v14 = vpop.eup %1854 }
 0x44c   : > { %v785_v15 = vmul.f32 %v1855_v14, %v1851_v2 }
 0x44e   : > { %v787_v16 = vpack.c.bf16 %v785_v15, %v785_v15 }
 0x450   : > { %1601 = vmatmul.msk.bf16.vlgmr.msrb.gmra.mxu3 %vm763_vm6, %v787_v16 }
 0x474   : > { %v806_v17 = vpop.f32.mrf.mxu3 }
 0x47c   : > { %v808_v18 = vpop.f32.mrf.mxu3 }
 0x4d3   : > { %v827_v20 = vpop.f32.mrf.mxu3 }
 0x4d4   : > { %832 = vrot.lane.b32.xlu1 %v827_v20, %s2115_s9 }
 0x4db   : > { %v829_v21 = vpop.f32.mrf.mxu3 }
 0x546   : > { %v833_v23 = vpop.permute.xlu1 %832 }
 0x547   : > { %v835_v24 = vsel %vm712_vm5, %v806_v17, %v833_v23  ;;  %v1725_v23 = vld [vmem:[%s2586_s4 + $0x10] sm:$0xff] }
 0x548   : > { %v836_v25 = vpack.c.bf16 %v835_v24, %v835_v24  ;;  %1072 = vmatpush.bf16.msra.mxu3 %v1725_v23 }
 0x54a   : > { %1610 = vmatmul.msk.bf16.vlgmr.msrb.gmra.mxu0 %vm626_vm0, %v836_v25 }
 0x5c7   : > { %v869_v27 = vpop.f32.mrf.mxu0 }
 0x5c8   : > { %v870_v28 = vadd.f32 %v1829_v26, %v869_v27 }
 0x5ca   : > { %v873_v29 = vadd.f32 %v870_v28, %v2374_v30  ;;  %v1719_v30 = vld [vmem:[%s2592_s10] sm:$0xff] }
 0x5cb   : > { %937 = vmatpush.bf16.msrb.mxu1 %v1719_v30 }
 0x5cc   : > { %v876_v31 = vsel %vm626_vm0, %v873_v29, 0.0 }
 0x5cd   : > { %877 = vadd.xlane.f32.xlu2 %v876_v31 }
 0x5cf   : > { %v871_v32 = vpop.f32.mrf.mxu0 }
 0x640   : > { %v878_v33 = vpop.xlane.xlu2 %877 }
 0x641   : > { %v879_v34 = vmul.f32 %v878_v33, %v2360_v8 }
 0x643   : > { %v880_v35 = vsub.f32 %v873_v29, %v879_v34  ;;  %v1834_v34 = vld [vmem:[%s2643_s15] ss:$0 sm:$0xff] }
 0x645   : > { %v881_v36 = vmul.f32 %v880_v35, %v880_v35 }
 0x647   : > { %v882_v37 = vsel %vm626_vm0, %v881_v36, 0.0  ;;  %v1835_v36 = vld [vmem:[#allocation10] ss:$0 sm:$0xff] }
 0x648   : > { %883 = vadd.xlane.f32.xlu1 %v882_v37 }
 0x6bb   : > { %v884_v39 = vpop.xlane.xlu1 %883 }
 0x6bc   : > { %v885_v40 = vmul.f32 %v884_v39, %v2360_v8 }
 0x6be   : > { %v886_v41 = vadd.f32 1e-12, %v885_v40  ;;  %v1836_v40 = vld [vmem:[%s2587_s5 + $0x1] ss:$0 sm:$0xff] }
 0x6c0   : > { %1856 = vrsqrt.f32 %v886_v41  ;;  %vm893_vm9 = vweird.f32 %v886_v41 }
 0x6c6   : > { %v1857_v42 = vpop.eup %1856 }
 0x6c7   : > { %v888_v43 = vmul.f32 %v1857_v42, %v886_v41  ;;  %vm894_vm8 = vweird.f32 %v1857_v42 }
 0x6c8   : > { %vm895_vm10 = vmor %vm893_vm9, %vm894_vm8 }
 0x6c9   : > { %v889_v44 = vmul.f32 %v1857_v42, %v888_v43 }
 0x6cb   : > { %v890_v45 = vmul.f32 0.5, %v889_v44 }
 0x6cd   : > { %v891_v46 = vsub.f32 1.5, %v890_v45 }
 0x6cf   : > { %v892_v48 = vmul.f32 %v1857_v42, %v891_v46 }
 0x6d1   : > { %v896_v50 = vsel %vm895_vm10, %v1857_v42, %v892_v48 }
 0x6d2   : > { %v897_v51 = vmul.f32 %v896_v50, %v880_v35 }
 0x6d4   : > { %v901_v53 = vmul.f32 %v1830_v49, %v897_v51 }
 0x6d6   : > { %v905_v54 = vadd.f32 %v1831_v52, %v901_v53 }
 0x6d8   : > { %v906_v55 = vpack.c.bf16 %v905_v54, %v905_v54 }
 0x6da   : > { %1619 = vmatmul.msk.bf16.vlgmr.msrb.gmra.mxu1 %vm626_vm0, %v906_v55 }
 0x757   : > { %v939_v61 = vpop.f32.mrf.mxu1 }
 0x758   : > { %v940_v62 = vadd.f32 %v1832_v60, %v939_v61 }
 0x75a   : > { %v944_v63 = vmul.f32 0.044715, %v940_v62  ;;  %v943_v6 = vmul.f32 0.5, %v940_v62 }
 0x75c   : > { %v945_v0 = vmul.f32 %v944_v63, %v940_v62 }
 0x75e   : > { %v946_v1 = vmul.f32 %v945_v0, %v940_v62 }
 0x75f   : > { %v941_v2 = vpop.f32.mrf.mxu1 }
 0x760   : > { %v947_v3 = vadd.f32 %v946_v1, %v940_v62 }
 0x762   : > { %v948_v4 = vmul.f32 0.7978846, %v947_v3 }
 0x764   : > { %1858 = vtanh.f32 %v948_v4 }
 0x76a   : > { %v1859_v5 = vpop.eup %1858 }
 0x76b   : > { %v950_v7 = vadd.f32 1.0, %v1859_v5 }
 0x76d   : > { %v951_v9 = vmul.f32 %v950_v7, %v943_v6 }
 0x76f   : > { %v952_v10 = vpack.c.bf16 %v951_v9, %v951_v9 }
 0x771   : > { %1636 = vmatmul.msk.bf16.vlgmr.msrb.gmra.mxu2 %vm989_vm11, %v952_v10 }
 0x7f4   : > { %v1002_v12 = vpop.f32.mrf.mxu2 }
 0x7f5   : > { %v1003_v13 = vadd.f32 %v1833_v11, %v1002_v12 }
 0x7f7   : > { %v1006_v14 = vadd.f32 %v1003_v13, %v905_v54 }
 0x7f9   : > { %v1009_v15 = vsel %vm626_vm0, %v1006_v14, 0.0 }
 0x7fa   : > { %1010 = vadd.xlane.f32.xlu0 %v1009_v15 }
 0x7fc   : > { %v1004_v16 = vpop.f32.mrf.mxu2 }
 0x86d   : > { %v1011_v17 = vpop.xlane.xlu0 %1010 }
 0x86e   : > { %v1012_v18 = vmul.f32 %v1011_v17, %v2360_v8 }
 0x870   : > { %v1013_v19 = vsub.f32 %v1006_v14, %v1012_v18 }
 0x872   : > { %v1014_v20 = vmul.f32 %v1013_v19, %v1013_v19 }
 0x874   : > { %v1015_v21 = vsel %vm626_vm0, %v1014_v20, 0.0 }
 0x875   : > { %1016 = vadd.xlane.f32.xlu0 %v1015_v21 }
 0x8e8   : > { %v1017_v24 = vpop.xlane.xlu0 %1016 }
 0x8e9   : > { %v1018_v25 = vmul.f32 %v1017_v24, %v2360_v8  ;;  %v1728_v24 = vld [vmem:[%s2588_s6 + $0x18] sm:$0xff] }
 0x8eb   : > { %v1019_v26 = vadd.f32 1e-12, %v1018_v25 }
 0x8ed   : > { %1860 = vrsqrt.f32 %v1019_v26  ;;  %vm1026_vm13 = vweird.f32 %v1019_v26 }
 0x8f3   : > { %v1861_v27 = vpop.eup %1860 }
 0x8f4   : > { %v1021_v28 = vmul.f32 %v1861_v27, %v1019_v26  ;;  %vm1027_vm12 = vweird.f32 %v1861_v27 }
 0x8f5   : > { %vm1028_vm14 = vmor %vm1026_vm13, %vm1027_vm12 }
 0x8f6   : > { %v1022_v29 = vmul.f32 %v1861_v27, %v1021_v28 }
 0x8f8   : > { %v1023_v31 = vmul.f32 0.5, %v1022_v29  ;;  %v1727_v29 = vld [vmem:[%s2588_s6 + $0x10] sm:$0xff] }
 0x8fa   : > { %v1024_v32 = vsub.f32 1.5, %v1023_v31 }
 0x8fc   : > { %v1025_v33 = vmul.f32 %v1861_v27, %v1024_v32 }
 0x8fe   : > { %v1029_v35 = vsel %vm1028_vm14, %v1861_v27, %v1025_v33 }
 0x8ff   : > { %v1030_v37 = vmul.f32 %v1029_v35, %v1013_v19 }
 0x901   : > { %v1034_v38 = vmul.f32 %v1834_v34, %v1030_v37  ;;  %v1837_v34 = vld [vmem:[%s2589_s7 + $0x1] ss:$0 sm:$0xff] }
 0x903   : > { %v2464_v30 = vadd.f32 %v1835_v36, %v1034_v38 }
 0x905   : > { %v1039_v39 = vpack.c.bf16 %v2464_v30, %v2464_v30 }
 0x907   : > { %1650 = vmatmul.msk.bf16.vlgmr.msra.gmra.mxu3 %vm626_vm0, %v1039_v39 }
 0x98a   : > { %v1074_v41 = vpop.f32.mrf.mxu3 }
 0x98b   : > { %v1075_v42 = vadd.f32 %v1836_v40, %v1074_v41 }
 0x98d   : > { %v1082_v43 = vpack.c.bf16 %v1075_v42, %v1075_v42  ;;  %1079 = vrot.lane.b32.xlu0 %v1075_v42, %s2112_s11  ;;  %s2116_s11 = smov 32  }
 0x98f   : > { %v1085_v44 = vunpack.c.l.b16 %v1082_v43 }
 0x991   : > { %v1086_v46 = vpack.c.b16 %v1085_v44, %v1085_v44 }
 0x992   : > { %v1076_v45 = vpop.f32.mrf.mxu3 }
 0x993   : > { %v1730_v45 = vld [vmem:[%s2592_s10 + $0x18] sm:$0xff] }
 0x995   : > { %1087 = vrot.lane.b32.xlu0 %v1086_v46, %s2113_s29 }
 0x9ff   : > { %v1080_v48 = vpop.permute.xlu0 %1079 }
 0xa00   : > { %v1083_v49 = vpack.c.bf16 %v1080_v48, %v1080_v48 }
 0xa02   : > { %v1109_v50 = vunpack.c.l.b16 %v1083_v49 }
 0xa04   : > { %v1110_v51 = vpack.c.b16 %v1109_v50, %v1109_v50 }
 0xa06   : > { %1111 = vrot.lane.b32.xlu2 %v1110_v51, %s2113_s29 }
 0xa07   : > { %v1088_v52 = vpop.permute.xlu0 %1087 }
 0xa08   : > { %v1093_v53 = vsel %vm712_vm5, %v1088_v52, 0 }
 0xa09   : > { %1102 = vmatpush.bf16.xpose.msra.mxu0 %v1093_v53 }
 0xa0e   : > { %1181 = vrot.lane.b32.xlu2 %v1110_v51, %s2114_s21 }
 0xa10   : > { %1651 = vmatmul.msk.bf16.vlgmr.msra.gmra.mxu0 %vm712_vm5, %v1082_v43 }
 0xa11   : > { %1239 = vmatpush.bf16.msrb.mxu0 %v1728_v24 }
 0xa15   : > { %1240 = vmatpush.bf16.msrb.mxu0 %v1727_v29 }
 0xa16   : > { %1160 = vrot.lane.b32.xlu2 %v1086_v46, %s2114_s21 }
 0xa60   : > { %v1112_v54 = vpop.permute.xlu2 %1111 }
 0xa61   : > { %v1117_v55 = vsel %vm712_vm5, %v1112_v54, 0 }
 0xa62   : > { %1126 = vmatpush.bf16.xpose.msra.mxu1 %v1117_v55 }
 0xa68   : > { %v1182_v56 = vpop.permute.xlu2 %1181 }
 0xa69   : > { %v1187_v57 = vsel %vm793_vm7, %v1182_v56, 0  ;;  %1652 = vmatmul.msk.bf16.vlgmr.msra.gmra.mxu1 %vm712_vm5, %v1083_v49  ;;  %v1838_v56 = vld [vmem:[%s2590_s8 + $0x1] ss:$0 sm:$0xff] }
 0xa6a   : > { %1196 = vmatpush.bf16.msrb.mxu3 %v1187_v57  ;;  %1313 = vmatpush.bf16.msrb.mxu1 %v1730_v45 }
 0xa70   : > { %v1161_v58 = vpop.permute.xlu2 %1160 }
 0xa71   : > { %v1166_v59 = vsel %vm793_vm7, %v1161_v58, 0  ;;  %v1839_v58 = vld [vmem:[#allocation8 + $0x1] ss:$0 sm:$0xff]  ;;  %vm1439_vm7 = vcmask 1040384  }
 0xa72   : > { %1175 = vmatpush.bf16.msra.mxu2 %v1166_v59 }
 0xa8d   : > { %v1104_v60 = vpop.f32.mrf.mxu0 }
 0xa8e   : > { %v1132_v61 = vmul.f32 0.25, %v1104_v60 }
 0xa90   : > { %v1134_v62 = vadd.f32 %v2391_v47, %v1132_v61 }
 0xa92   : > { %v1136_v63 = vsel %vm763_vm6, %v1134_v62, -inf }
 0xa93   : > { %1137 = vmax.xlane.f32.xlu0 %v1136_v63  ;;  %v1734_v63 = vld [vmem:[%s2639_s18 + $0x38] sm:$0xff] }
 0xa94   : > { %1375 = vmatpush.bf16.msrb.mxu2 %v1734_v63 }
 0xa95   : > { %v1106_v0 = vpop.f32.mrf.mxu0 }
 0xa96   : > { %v1733_v0 = vld [vmem:[%s2639_s18 + $0x30] sm:$0xff] }
 0xa98   : > { %1376 = vmatpush.bf16.msrb.mxu2 %v1733_v0 }
 0xae6   : > { %v1128_v1 = vpop.f32.mrf.mxu1 }
 0xae7   : > { %v1133_v2 = vmul.f32 0.25, %v1128_v1  ;;  %v1732_v1 = vld [vmem:[%s2639_s18 + $0x28] sm:$0xff] }
 0xae8   : > { %1377 = vmatpush.bf16.msrb.mxu2 %v1732_v1 }
 0xae9   : > { %v1135_v3 = vadd.f32 %v2391_v47, %v1133_v2  ;;  %v1731_v2 = vld [vmem:[%s2639_s18 + $0x20] sm:$0xff] }
 0xaeb   : > { %v1139_v4 = vsel %vm763_vm6, %v1135_v3, -inf }
 0xaec   : > { %1140 = vmax.xlane.f32.xlu1 %v1139_v4  ;;  %1378 = vmatpush.bf16.msrb.mxu2 %v1731_v2 }
 0xaee   : > { %v1130_v5 = vpop.f32.mrf.mxu1 }
 0xb06   : > { %v1138_v6 = vpop.xlane.xlu0 %1137 }
 0xb07   : > { %v1142_v10 = vsub.f32 %v1134_v62, %v1138_v6 }
 0xb09   : > { %v1144_v12 = vmul.f32 1.442695, %v1142_v10 }
 0xb5f   : > { %v1141_v7 = vpop.xlane.xlu1 %1140 }
 0xb60   : > { %v1143_v9 = vsub.f32 %v1135_v3, %v1141_v7  ;;  %v1840_v3 = vld [vmem:[%s2640_s17 + $0x1] ss:$0 sm:$0xff] }
 0xb62   : > { %v1146_v11 = vmul.f32 1.442695, %v1143_v9 }
 0xb64   : > { %1862 = vpow2.f32 %v1146_v11 }
 0xb65   : > { %1864 = vpow2.f32 %v1144_v12 }
 0xb6a   : > { %v1863_v13 = vpop.eup %1862 }
 0xb6b   : > { %v1151_v14 = vsel %vm763_vm6, %v1863_v13, 0.0  ;;  %v1865_v15 = vpop.eup %1864 }
 0xb6c   : > { %1152 = vadd.xlane.f32.xlu1 %v1151_v14  ;;  %v1148_v16 = vsel %vm763_vm6, %v1865_v15, 0.0 }
 0xb74   : > { %1149 = vadd.xlane.f32.xlu1 %v1148_v16 }
 0xbdf   : > { %v1153_v47 = vpop.xlane.xlu1 %1152 }
 0xbe0   : > { %1866 = vrcp.f32 %v1153_v47 }
 0xbe6   : > { %v1867_v17 = vpop.eup %1866 }
 0xbe7   : > { %v1157_v18 = vmul.f32 %v1867_v17, %v1863_v13  ;;  %v1150_v19 = vpop.xlane.xlu1 %1149  ;;  %v1841_v17 = vld [vmem:[%s2642_s0 + $0x1] ss:$0 sm:$0xff] }
 0xbe8   : > { %1868 = vrcp.f32 %v1150_v19 }
 0xbe9   : > { %v1159_v20 = vpack.c.bf16 %v1157_v18, %v1157_v18 }
 0xbeb   : > { %1654 = vmatmul.msk.bf16.vlgmr.msrb.gmra.mxu3 %vm763_vm6, %v1159_v20 }
 0xbee   : > { %v1869_v21 = vpop.eup %1868 }
 0xbef   : > { %v1156_v22 = vmul.f32 %v1869_v21, %v1865_v15 }
 0xbf1   : > { %v1158_v23 = vpack.c.bf16 %v1156_v22, %v1156_v22 }
 0xbf3   : > { %1653 = vmatmul.msk.bf16.vlgmr.msra.gmra.mxu2 %vm763_vm6, %v1158_v23  ;;  %vm1434_vm6 = vcmask 785408  }
 0xc6e   : > { %v1198_v25 = vpop.f32.mrf.mxu3 }
 0xc6f   : > { %1203 = vrot.lane.b32.xlu1 %v1198_v25, %s2115_s9  ;;  %s1453_s9 = scalar_lea.hbm %s2644_s26, %s1712_s19 }
 0xc70   : > { %s1457_s30 = sshll.u32 %s1453_s9, 4  ;;  %s1458_s30 = int_to_ptr.hbm [resolvable:$true] %s1457_s30 }
 0xc76   : > { %v1177_v26 = vpop.f32.mrf.mxu2  ;;  %v1200_v27 = vpop.f32.mrf.mxu3 }
 0xc7e   : > { %v1179_v28 = vpop.f32.mrf.mxu2 }
 0xce1   : > { %v1204_v31 = vpop.permute.xlu1 %1203 }
 0xce2   : > { %v1206_v32 = vsel %vm712_vm5, %v1177_v26, %v1204_v31 }
 0xce3   : > { %v1207_v33 = vpack.c.bf16 %v1206_v32, %v1206_v32 }
 0xce5   : > { %1668 = vmatmul.msk.bf16.vlgmr.msrb.gmra.mxu0 %vm626_vm0, %v1207_v33 }
 0xd62   : > { %v1242_v35 = vpop.f32.mrf.mxu0 }
 0xd63   : > { %v1243_v36 = vadd.f32 %v1837_v34, %v1242_v35 }
 0xd65   : > { %v1246_v37 = vadd.f32 %v1243_v36, %v2464_v30  ;;  %v1729_v30 = vld [vmem:[%s2592_s10 + $0x10] sm:$0xff] }
 0xd66   : > { %1314 = vmatpush.bf16.msrb.mxu1 %v1729_v30 }
 0xd67   : > { %v1251_v38 = vsel %vm626_vm0, %v1246_v37, 0.0 }
 0xd68   : > { %1252 = vadd.xlane.f32.xlu2 %v1251_v38  ;;  %v1842_v38 = vld [vmem:[%s2643_s15 + $0x1] ss:$0 sm:$0xff] }
 0xd6a   : > { %v1244_v39 = vpop.f32.mrf.mxu0 }
 0xddb   : > { %v1253_v40 = vpop.xlane.xlu2 %1252 }
 0xddc   : > { %v1254_v41 = vmul.f32 %v1253_v40, %v2360_v8 }
 0xdde   : > { %v1255_v42 = vsub.f32 %v1246_v37, %v1254_v41 }
 0xde0   : > { %v1256_v43 = vmul.f32 %v1255_v42, %v1255_v42 }
 0xde2   : > { %v1257_v44 = vsel %vm626_vm0, %v1256_v43, 0.0 }
 0xde3   : > { %1258 = vadd.xlane.f32.xlu0 %v1257_v44 }
 0xe56   : > { %v1259_v46 = vpop.xlane.xlu0 %1258 }
 0xe57   : > { %v1260_v48 = vmul.f32 %v1259_v46, %v2360_v8 }
 0xe59   : > { %v1261_v49 = vadd.f32 1e-12, %v1260_v48 }
 0xe5b   : > { %1870 = vrsqrt.f32 %v1261_v49  ;;  %vm1268_vm1 = vweird.f32 %v1261_v49 }
 0xe61   : > { %v1871_v50 = vpop.eup %1870 }
 0xe62   : > { %v1263_v51 = vmul.f32 %v1871_v50, %v1261_v49  ;;  %vm1269_vm15 = vweird.f32 %v1871_v50 }
 0xe63   : > { %vm1270_vm2 = vmor %vm1268_vm1, %vm1269_vm15 }
 0xe64   : > { %v1264_v52 = vmul.f32 %v1871_v50, %v1263_v51 }
 0xe66   : > { %v1265_v53 = vmul.f32 0.5, %v1264_v52 }
 0xe68   : > { %v1266_v54 = vsub.f32 1.5, %v1265_v53 }
 0xe6a   : > { %v1267_v55 = vmul.f32 %v1871_v50, %v1266_v54 }
 0xe6c   : > { %v1271_v57 = vsel %vm1270_vm2, %v1871_v50, %v1267_v55 }
 0xe6d   : > { %v1272_v59 = vmul.f32 %v1271_v57, %v1255_v42 }
 0xe6f   : > { %v1276_v60 = vmul.f32 %v1838_v56, %v1272_v59 }
 0xe71   : > { %v1280_v61 = vadd.f32 %v1839_v58, %v1276_v60 }
 0xe73   : > { %v1281_v62 = vpack.c.bf16 %v1280_v61, %v1280_v61 }
 0xe75   : > { %1683 = vmatmul.msk.bf16.vlgmr.msrb.gmra.mxu1 %vm626_vm0, %v1281_v62 }
 0xef2   : > { %v1316_v4 = vpop.f32.mrf.mxu1 }
 0xef3   : > { %v1317_v5 = vadd.f32 %v1840_v3, %v1316_v4 }
 0xef5   : > { %v1321_v6 = vmul.f32 0.044715, %v1317_v5  ;;  %v1320_v14 = vmul.f32 0.5, %v1317_v5 }
 0xef7   : > { %v1322_v7 = vmul.f32 %v1321_v6, %v1317_v5 }
 0xef9   : > { %v1323_v9 = vmul.f32 %v1322_v7, %v1317_v5 }
 0xefa   : > { %v1318_v10 = vpop.f32.mrf.mxu1 }
 0xefb   : > { %v1324_v11 = vadd.f32 %v1323_v9, %v1317_v5 }
 0xefd   : > { %v1325_v12 = vmul.f32 0.7978846, %v1324_v11 }
 0xeff   : > { %1872 = vtanh.f32 %v1325_v12 }
 0xf05   : > { %v1873_v13 = vpop.eup %1872 }
 0xf06   : > { %v1327_v15 = vadd.f32 1.0, %v1873_v13 }
 0xf08   : > { %v1328_v16 = vmul.f32 %v1327_v15, %v1320_v14 }
 0xf0a   : > { %v1329_v47 = vpack.c.bf16 %v1328_v16, %v1328_v16 }
 0xf0c   : > { %1709 = vmatmul.msk.bf16.vlgmr.msrb.gmra.mxu2 %vm989_vm11, %v1329_v47 }
 0xf8f   : > { %v1380_v18 = vpop.f32.mrf.mxu2 }
 0xf90   : > { %v1381_v19 = vadd.f32 %v1841_v17, %v1380_v18 }
 0xf92   : > { %v1384_v20 = vadd.f32 %v1381_v19, %v1280_v61 }
 0xf94   : > { %v1389_v21 = vsel %vm626_vm0, %v1384_v20, 0.0 }
 0xf95   : > { %1390 = vadd.xlane.f32.xlu1 %v1389_v21 }
 0xf97   : > { %v1382_v22 = vpop.f32.mrf.mxu2 }
0x1008   : > { %v1391_v23 = vpop.xlane.xlu1 %1390 }
0x1009   : > { %v1392_v24 = vmul.f32 %v1391_v23, %v2360_v8 }
0x100b   : > { %v1393_v25 = vsub.f32 %v1384_v20, %v1392_v24 }
0x100d   : > { %v1394_v26 = vmul.f32 %v1393_v25, %v1393_v25 }
0x100f   : > { %v1395_v27 = vsel %vm626_vm0, %v1394_v26, 0.0 }
0x1010   : > { %1396 = vadd.xlane.f32.xlu0 %v1395_v27 }
0x1083   : > { %v1397_v28 = vpop.xlane.xlu0 %1396 }
0x1084   : > { %v1398_v29 = vmul.f32 %v1397_v28, %v2360_v8  ;;  %v1843_v8 = vld [vmem:[#allocation10 + $0x1] ss:$0 sm:$0xff] }
0x1086   : > { %v1399_v31 = vadd.f32 1e-12, %v1398_v29 }
0x1088   : > { %1874 = vrsqrt.f32 %v1399_v31  ;;  %vm1406_vm4 = vweird.f32 %v1399_v31 }
0x108e   : > { %v1875_v32 = vpop.eup %1874 }
0x108f   : > { %v1401_v33 = vmul.f32 %v1875_v32, %v1399_v31  ;;  %vm1407_vm3 = vweird.f32 %v1875_v32 }
0x1090   : > { %vm1408_vm5 = vmor %vm1406_vm4, %vm1407_vm3 }
0x1091   : > { %v1402_v34 = vmul.f32 %v1875_v32, %v1401_v33 }
0x1093   : > { %v1403_v35 = vmul.f32 0.5, %v1402_v34 }
0x1095   : > { %v1404_v36 = vsub.f32 1.5, %v1403_v35 }
0x1097   : > { %v1405_v37 = vmul.f32 %v1875_v32, %v1404_v36 }
0x1099   : > { %v1409_v39 = vsel %vm1408_vm5, %v1875_v32, %v1405_v37 }
0x109a   : > { %v1410_v40 = vmul.f32 %v1409_v39, %v1393_v25 }
0x109c   : > { %v1414_v41 = vmul.f32 %v1842_v38, %v1410_v40 }
0x109e   : > { %v1418_v42 = vadd.f32 %v1843_v8, %v1414_v41 }
0x10a0   : > { %v1424_v43 = vrot.slane %v1418_v42, 2  ;;  %v1420_v44 = vrot.slane %v1418_v42, 1  ;;  %v1428_v45 = vrot.slane %v1418_v42, 3 }
0x10a2   : > { %1425 = vrot.lane.b32.xlu2 %v1424_v43, %s2114_s21  ;;  %1421 = vrot.lane.b32.xlu0 %v1420_v44, %s2116_s11  ;;  %s2046_s11 = scalar_lea.hbm %s2644_s26, 4 }
0x10aa   : > { %1429 = vrot.lane.b32.xlu0 %v1428_v45, %s2113_s29  ;;  %s2040_s29 = sshra.s32 %s1458_s30, 4  ;;  %s2041_s29 = int_to_ptr.hbm [resolvable:$true] %s2040_s29 }
0x10ab   : > { %s2042_s12 = scalar_lea.hbm %s2041_s29, 2  ;;  %p2047_p2 = scmp.lt.s32.totalorder %s2041_s29, %s2644_s26 }
0x10ac   : > { %p2043_p1 = scmp.ne.s32.totalorder %s2041_s29, %s2042_s12  ;;  %p2048_p11 = scmp.lt.s32.totalorder %s2046_s11, %s2042_s12 }
0x10ae   : > { %p2044_p4 = pnand %p2043_p1, %p2285_p7  ;;  %p2049_p10 = por %p2048_p11, %p2047_p2 }
0x10b0   : > { %p2045_p8 = pneg %p2044_p4 }
0x10b2   : > { %p2050_p12 = pnand %p2049_p10, %p2045_p8 }
0x10fc   : > { %v1426_v48 = vpop.permute.xlu2 %1425 }
0x1114   : > { %v1422_v30 = vpop.permute.xlu0 %1421 }
0x1115   : > { %v1432_v46 = vsel %vm626_vm0, %v1418_v42, %v1422_v30 }
0x1116   : > { %v1433_v49 = vsel %vm989_vm11, %v1432_v46, %v1426_v48 }
0x111c   : > { %v1430_v50 = vpop.permute.xlu0 %1429 }
0x111d   : > { %v1435_v51 = vsel %vm1434_vm6, %v1433_v49, %v1430_v50 }
0x111e   : > { %v1437_v52 = vrot.slane %v1435_v51, 3 }
0x1120   : > { %v1440_v53 = vsel %vm1439_vm7, %v1435_v51, %v1437_v52 }
0x1121   : > { %1441 = vst [vmem:[%s620_s13] sm:$0x3] %v1440_v53 }
0x1122   : > { %2053 = shalt.err (!%p2050_p12)
}
0x1123   : > { %1751 = dma.vmem_to_hbm [thread:$0]  (%p2285_p7), %s1456_s16, 32, %s1458_s30, %s1443_s25  }
0x1124 PF: > { %s2646_s3 = sld [smem:[#allocation17_spill]] }
0x1125   : > { %s2648_s28 = sld [smem:[#allocation19_spill]] }
0x112a   : > { %s1469_s9 = sand.u32 1, %s2646_s3  }
0x112b   : > { %p2649_p13 = scmp.ge.s32.totalorder %s2648_s28, 2  ;;  %s1470_s13 = scalar_lea.sflag [#allocation4], %s1469_s9 }
0x112d   : > { %p1771_p9 = pnand %p2649_p13, %p2237_p6 }
0x112f   : > { %p1772_p0 = pneg %p1771_p9 }
0x1131   : > { %2087 = dma.done.wait (%p1772_p0), %s1470_s13, 32  }
0x1132   : > { %2089 = vsyncadd (%p1772_p0), %s1470_s13, 4294967264  ;;  %s2650_s24 = sld [smem:[#allocation21_spill]]  ;;  %s2653_s21 = smov %s2096_s22 }
0x1133   : > { %s2651_s29 = sld [smem:[#allocation18_spill]] }
0x1134   : > { %s2652_s23 = sld [smem:[#allocation22_spill]] }
0x1138   : > { %p33_p3 = scmp.ge.s32.totalorder %s2650_s24, 4  }
0x1139   : > { %s2654_s22 = smov %s2651_s29 }
0x113a   :  { %35 = sbr.rel (!%p33_p3) target bundleno = 18 (0x12), region = 166 }
0x113f   :  { %1476 = vsyncpa [#allocation3], 1 }
0x1140   :  { %1478 = vsyncpa [#allocation3 + $0x1], 1 }
0x1141   :  { %1479 = vsyncpa [#allocation6], 1 }
0x1142   :  { %1481 = vsyncpa [#allocation6 + $0x1], 1 }
0x1143   :  { %1482 = vsyncpa [#allocation9], 1 }
0x1144   :  { %1483 = vsyncpa [#allocation4], 1 }
0x1145   :  { %1485 = vsyncpa [#allocation4 + $0x1], 1 }

</bundles_post_ra>
